<compile_context>
chip_gen: v6e
topology: v6e:2x2x1
jax: 0.10.0
libtpu: 0.0.40
codegen_flags: <defaults>
</compile_context>

<pallas_src>
import math

import jax
import jax.numpy as jnp
from jax.experimental import pallas as pl
from jax.experimental.pallas import tpu as pltpu

# ---------------------------------------------------------------------------
# Model dimensions (small, consistent with the module's forward).
# ---------------------------------------------------------------------------
B = 2      # batch
S = 8      # sequence length
D = 32     # d_model (EncoderLayer.size)
H = 4      # attention heads
DK = D // H
DFF = 64   # feed-forward hidden size
EPS = 1e-6

# Row indices inside the packed LayerNorm/bias slab (shape (8, DFF)).
_A1, _B1, _A2, _B2, _BO, _BF2, _BF1, _PAD = range(8)


def _layernorm(x, a, b):
    """Matches the PyTorch LayerNorm: unbiased std, eps added to the std."""
    mean = jnp.mean(x, axis=-1, keepdims=True)
    var = jnp.sum((x - mean) ** 2, axis=-1, keepdims=True) * (1.0 / (D - 1))
    inv = pl.reciprocal(jnp.sqrt(var) + EPS, approx=False)   # exact recip (EUP)
    return a * (x - mean) * inv + b


def encoder_layer_kernel(x_ref, mask_ref, wqkv_ref, bqkv_ref, wo3_ref,
                         wffn_ref, vec_ref, out_ref):
    # ---- packed parameters (loaded once per grid step) -------------------
    a1  = vec_ref[_A1:_A1 + 1, :D]          # (1, D)
    b1  = vec_ref[_B1:_B1 + 1, :D]
    a2  = vec_ref[_A2:_A2 + 1, :D]
    b2  = vec_ref[_B2:_B2 + 1, :D]
    bo  = vec_ref[_BO:_BO + 1, :D]
    bf2 = vec_ref[_BF2:_BF2 + 1, :D]
    bf1 = vec_ref[_BF1:_BF1 + 1, :DFF]      # (1, DFF)

    wqkv = wqkv_ref[...]                    # (3H, D, DK)  [q-heads | k-heads | v-heads]
    bqkv = bqkv_ref[...]                    # (3H, 1, DK)
    wo3  = wo3_ref[...]                     # (H, DK, D)
    w1   = wffn_ref[0:D, :]                 # (D, DFF)
    w2   = wffn_ref[D:D + DFF, 0:D]         # (DFF, D)

    inv_sqrt_dk = 1.0 / math.sqrt(DK)
    bb = x_ref.shape[0]                     # static batch block (1 or B)

    for i in range(bb):                     # static, unrolled at trace time
        x = x_ref[i]                        # (S, D)
        mask = mask_ref[i]                  # (S, S)

        # ------------- sublayer[0]: x + self_attn(norm(x)) ----------------
        xn = _layernorm(x, a1, b1)

        # fused, head-batched Q/K/V projection -> (3H, S, DK)
        xn_b = jnp.broadcast_to(xn[None, :, :], (3 * H, S, D))
        qkv = jnp.einsum("jsd,jdk->jsk", xn_b, wqkv,
                         preferred_element_type=jnp.float32) + bqkv
        q3 = qkv[0:H]                       # (H, S, DK)
        k3 = qkv[H:2 * H]
        v3 = qkv[2 * H:3 * H]

        # all heads in one batched matmul + one softmax
        scores = jnp.einsum("hqd,hkd->hqk", q3, k3,
                            preferred_element_type=jnp.float32) * inv_sqrt_dk
        scores = jnp.where(mask[None, :, :] == 0.0, -1e9, scores)
        smax = jnp.max(scores, axis=-1, keepdims=True)
        p = jnp.exp(scores - smax)
        p = p * pl.reciprocal(jnp.sum(p, axis=-1, keepdims=True), approx=False)

        ctx = jnp.einsum("hqk,hkd->hqd", p, v3,
                         preferred_element_type=jnp.float32)        # (H, S, DK)

        # output projection distributed over heads: no lane-concat needed.
        attn_h = jnp.einsum("hqd,hdm->hqm", ctx, wo3,
                            preferred_element_type=jnp.float32)     # (H, S, D)
        attn = jnp.sum(attn_h, axis=0) + bo                         # (S, D)

        x1 = x + attn                       # dropout == identity (eval mode)

        # ------------- sublayer[1]: x + feed_forward(norm(x)) -------------
        xn2 = _layernorm(x1, a2, b2)
        hmid = jnp.dot(xn2, w1, preferred_element_type=jnp.float32) + bf1
        hmid = jnp.maximum(hmid, 0.0)                               # ReLU
        ff = jnp.dot(hmid, w2, preferred_element_type=jnp.float32) + bf2

        out_ref[i] = (x1 + ff).astype(out_ref.dtype)


def _default_batch_block():
    """v7x (2 TensorCores): keep a parallel batch axis; v5e/v6e: collapse."""
    try:
        kind = jax.devices()[0].device_kind.lower()
    except Exception:
        kind = ""
    return 1 if ("v7" in kind or "7x" in kind) else B


def encoder_layer(x, mask, packed, *, batch_block=None):
    """x: (B, S, D) f32, mask: (B, S, S) f32 (nonzero = attend)."""
    bb = _default_batch_block() if batch_block is None else batch_block
    assert B % bb == 0
    grid = (B // bb,)

    const2d = lambda shape: pl.BlockSpec(shape, lambda g: (0, 0))
    const3d = lambda shape: pl.BlockSpec(shape, lambda g: (0, 0, 0))

    in_specs = [
        pl.BlockSpec((bb, S, D), lambda g: (g, 0, 0)),   # x
        pl.BlockSpec((bb, S, S), lambda g: (g, 0, 0)),   # mask
        const3d((3 * H, D, DK)),                         # packed q/k/v weights
        const3d((3 * H, 1, DK)),                         # packed q/k/v biases
        const3d((H, DK, D)),                             # output projection (per head)
        const2d((D + DFF, DFF)),                         # packed FFN weights
        const2d((8, DFF)),                               # packed LN scales + biases
    ]

    return pl.pallas_call(
        encoder_layer_kernel,
        out_shape=jax.ShapeDtypeStruct((B, S, D), jnp.float32),
        grid_spec=pltpu.PrefetchScalarGridSpec(
            num_scalar_prefetch=0,
            grid=grid,
            in_specs=in_specs,
            out_specs=pl.BlockSpec((bb, S, D), lambda g: (g, 0, 0)),
        ),
        compiler_params=pltpu.CompilerParams(
            dimension_semantics=("parallel",)),
    )(x, mask, *packed)


# ---------------------------------------------------------------------------
# Parameters: natural (PyTorch-like) shapes + packing into kernel slabs.
# ---------------------------------------------------------------------------
def init_params(key):
    keys = jax.random.split(key, 12)
    scale = 0.02
    a1 = jnp.ones((1, D), jnp.float32)
    b1 = jnp.zeros((1, D), jnp.float32)
    a2 = jnp.ones((1, D), jnp.float32)
    b2 = jnp.zeros((1, D), jnp.float32)
    wq = scale * jax.random.normal(keys[0], (D, D), jnp.float32)
    bq = scale * jax.random.normal(keys[1], (1, D), jnp.float32)
    wk = scale * jax.random.normal(keys[2], (D, D), jnp.float32)
    bk = scale * jax.random.normal(keys[3], (1, D), jnp.float32)
    wv = scale * jax.random.normal(keys[4], (D, D), jnp.float32)
    bv = scale * jax.random.normal(keys[5], (1, D), jnp.float32)
    wo = scale * jax.random.normal(keys[6], (D, D), jnp.float32)
    bo = scale * jax.random.normal(keys[7], (1, D), jnp.float32)
    w1 = scale * jax.random.normal(keys[8], (D, DFF), jnp.float32)
    bf1 = scale * jax.random.normal(keys[9], (1, DFF), jnp.float32)
    w2 = scale * jax.random.normal(keys[10], (DFF, D), jnp.float32)
    bf2 = scale * jax.random.normal(keys[11], (1, D), jnp.float32)
    return (a1, b1, wq, bq, wk, bk, wv, bv, wo, bo, a2, b2, w1, bf1, w2, bf2)


def pack_params(params):
    """Pack the 18 natural parameters into 5 kernel inputs (fewer DMAs)."""
    (a1, b1, wq, bq, wk, bk, wv, bv, wo, bo, a2, b2, w1, bf1, w2, bf2) = params

    w_qkv3 = jnp.stack(
        [w[:, h * DK:(h + 1) * DK] for w in (wq, wk, wv) for h in range(H)],
        axis=0)                                               # (3H, D, DK)
    b_qkv3 = jnp.stack(
        [b.reshape(-1)[h * DK:(h + 1) * DK]
         for b in (bq, bk, bv) for h in range(H)],
        axis=0)[:, None, :]                                   # (3H, 1, DK)
    wo3 = wo.reshape(H, DK, D)                                # (H, DK, D)
    w_ffn = jnp.concatenate(
        [w1, jnp.pad(w2, ((0, 0), (0, DFF - D)))], axis=0)    # (D+DFF, DFF)

    def row(v):
        v = v.reshape(-1)
        return jnp.pad(v, (0, DFF - v.shape[0]))

    vec = jnp.stack([row(a1), row(b1), row(a2), row(b2), row(bo), row(bf2),
                     row(bf1), jnp.zeros((DFF,), jnp.float32)], axis=0)  # (8, DFF)
    return (w_qkv3, b_qkv3, wo3, w_ffn, vec)


# ---------------------------------------------------------------------------
# Pure-JAX reference mirroring the PyTorch forward (eval mode).
# ---------------------------------------------------------------------------
def _reference(x, mask, params):
    (a1, b1, wq, bq, wk, bk, wv, bv, wo, bo, a2, b2, w1, bf1, w2, bf2) = params

    def ln(x, a, b):
        mean = jnp.mean(x, axis=-1, keepdims=True)
        var = jnp.sum((x - mean) ** 2, axis=-1, keepdims=True) / (D - 1)
        return a * (x - mean) / (jnp.sqrt(var) + EPS) + b

    xn = ln(x, a1, b1)
    q = xn @ wq + bq
    k = xn @ wk + bk
    v = xn @ wv + bv
    qh = q.reshape(B, S, H, DK).transpose(0, 2, 1, 3)
    kh = k.reshape(B, S, H, DK).transpose(0, 2, 1, 3)
    vh = v.reshape(B, S, H, DK).transpose(0, 2, 1, 3)
    scores = jnp.einsum("bhqd,bhkd->bhqk", qh, kh) / math.sqrt(DK)
    scores = jnp.where(mask[:, None, :, :] == 0.0, -1e9, scores)
    p = jax.nn.softmax(scores, axis=-1)
    attn = jnp.einsum("bhqk,bhkd->bhqd", p, vh).transpose(0, 2, 1, 3).reshape(B, S, D)
    attn = attn @ wo + bo
    x1 = x + attn
    xn2 = ln(x1, a2, b2)
    ff = jnp.maximum(xn2 @ w1 + bf1, 0.0) @ w2 + bf2
    return x1 + ff


if __name__ == "__main__":
    key = jax.random.PRNGKey(0)
    kx, km, kp = jax.random.split(key, 3)

    x = jax.random.normal(kx, (B, S, D), jnp.float32)
    # mask: attend everywhere except pad the last position of batch element 1
    mask = jnp.ones((B, S, S), jnp.float32)
    mask = mask.at[1, :, -1].set(0.0)

    params = init_params(kp)
    packed = pack_params(params)

    out = encoder_layer(x, mask, packed)
    out = jax.block_until_ready(out)

    ref = _reference(x, mask, params)
    assert out.shape == (B, S, D)
    assert jnp.allclose(out, ref, atol=1e-4, rtol=1e-4), (
        float(jnp.max(jnp.abs(out - ref))))

    print("KERNEL_OK")
</pallas_src>

<mosaic_0001>
module attributes {stable_mosaic.version = 11 : i64} {
  func.func @encoder_layer_kernel(%arg0: i32, %arg1: memref<2x8x32xf32, #tpu.memory_space<vmem>>, %arg2: memref<2x8x8xf32, #tpu.memory_space<vmem>>, %arg3: memref<12x32x8xf32, #tpu.memory_space<vmem>>, %arg4: memref<12x1x8xf32, #tpu.memory_space<vmem>>, %arg5: memref<4x8x32xf32, #tpu.memory_space<vmem>>, %arg6: memref<96x64xf32, #tpu.memory_space<vmem>>, %arg7: memref<8x64xf32, #tpu.memory_space<vmem>>, %arg8: memref<2x8x32xf32, #tpu.memory_space<vmem>>) attributes {dimension_semantics = [#tpu.dimension_semantics<parallel>], iteration_bounds = array<i64: 1>, scalar_prefetch = 0 : i64, scratch_operands = 0 : i64, tpu.core_type = #tpu.core_type<tc>, window_params = [{transform_indices = @transform_0, window_bounds = array<i64: 2, 8, 32>}, {transform_indices = @transform_1, window_bounds = array<i64: 2, 8, 8>}, {pipeline_mode = #tpu.pipeline_mode<synchronous>, transform_indices = @transform_2, window_bounds = array<i64: 12, 32, 8>}, {pipeline_mode = #tpu.pipeline_mode<synchronous>, transform_indices = @transform_3, window_bounds = array<i64: 12, 1, 8>}, {pipeline_mode = #tpu.pipeline_mode<synchronous>, transform_indices = @transform_4, window_bounds = array<i64: 4, 8, 32>}, {pipeline_mode = #tpu.pipeline_mode<synchronous>, transform_indices = @transform_5, window_bounds = array<i64: 96, 64>}, {pipeline_mode = #tpu.pipeline_mode<synchronous>, transform_indices = @transform_6, window_bounds = array<i64: 8, 64>}, {transform_indices = @transform_7, window_bounds = array<i64: 2, 8, 32>}]} {
    %c0 = arith.constant 0 : index
    %c0_0 = arith.constant 0 : index
    %0 = vector.load %arg7[%c0, %c0_0] : memref<8x64xf32, #tpu.memory_space<vmem>>, vector<1x32xf32>
    %c1 = arith.constant 1 : index
    %c0_1 = arith.constant 0 : index
    %1 = vector.load %arg7[%c1, %c0_1] : memref<8x64xf32, #tpu.memory_space<vmem>>, vector<1x32xf32>
    %c2 = arith.constant 2 : index
    %c0_2 = arith.constant 0 : index
    %2 = vector.load %arg7[%c2, %c0_2] : memref<8x64xf32, #tpu.memory_space<vmem>>, vector<1x32xf32>
    %c3 = arith.constant 3 : index
    %c0_3 = arith.constant 0 : index
    %3 = vector.load %arg7[%c3, %c0_3] : memref<8x64xf32, #tpu.memory_space<vmem>>, vector<1x32xf32>
    %c4 = arith.constant 4 : index
    %c0_4 = arith.constant 0 : index
    %4 = vector.load %arg7[%c4, %c0_4] : memref<8x64xf32, #tpu.memory_space<vmem>>, vector<1x32xf32>
    %c5 = arith.constant 5 : index
    %c0_5 = arith.constant 0 : index
    %5 = vector.load %arg7[%c5, %c0_5] : memref<8x64xf32, #tpu.memory_space<vmem>>, vector<1x32xf32>
    %c6 = arith.constant 6 : index
    %c0_6 = arith.constant 0 : index
    %6 = vector.load %arg7[%c6, %c0_6] : memref<8x64xf32, #tpu.memory_space<vmem>>, vector<1x64xf32>
    %c0_7 = arith.constant 0 : index
    %c0_8 = arith.constant 0 : index
    %c0_9 = arith.constant 0 : index
    %7 = vector.load %arg3[%c0_7, %c0_8, %c0_9] : memref<12x32x8xf32, #tpu.memory_space<vmem>>, vector<12x32x8xf32>
    %c0_10 = arith.constant 0 : index
    %c0_11 = arith.constant 0 : index
    %c0_12 = arith.constant 0 : index
    %8 = vector.load %arg4[%c0_10, %c0_11, %c0_12] : memref<12x1x8xf32, #tpu.memory_space<vmem>>, vector<12x1x8xf32>
    %c0_13 = arith.constant 0 : index
    %c0_14 = arith.constant 0 : index
    %c0_15 = arith.constant 0 : index
    %9 = vector.load %arg5[%c0_13, %c0_14, %c0_15] : memref<4x8x32xf32, #tpu.memory_space<vmem>>, vector<4x8x32xf32>
    %c0_16 = arith.constant 0 : index
    %c0_17 = arith.constant 0 : index
    %10 = vector.load %arg6[%c0_16, %c0_17] : memref<96x64xf32, #tpu.memory_space<vmem>>, vector<32x64xf32>
    %c32 = arith.constant 32 : index
    %c0_18 = arith.constant 0 : index
    %11 = vector.load %arg6[%c32, %c0_18] : memref<96x64xf32, #tpu.memory_space<vmem>>, vector<64x32xf32>
    %c0_19 = arith.constant 0 : index
    %c0_20 = arith.constant 0 : index
    %c0_21 = arith.constant 0 : index
    %12 = vector.load %arg1[%c0_19, %c0_20, %c0_21] : memref<2x8x32xf32, #tpu.memory_space<vmem>>, vector<1x8x32xf32>
    %13 = vector.shape_cast %12 : vector<1x8x32xf32> to vector<8x32xf32>
    %c0_22 = arith.constant 0 : index
    %c0_23 = arith.constant 0 : index
    %c0_24 = arith.constant 0 : index
    %14 = vector.load %arg2[%c0_22, %c0_23, %c0_24] : memref<2x8x8xf32, #tpu.memory_space<vmem>>, vector<1x8x8xf32>
    %15 = vector.shape_cast %14 : vector<1x8x8xf32> to vector<8x8xf32>
    %cst = arith.constant dense<0.000000e+00> : vector<8xf32>
    %16 = vector.multi_reduction <add>, %13, %cst [1] : vector<8x32xf32> to vector<8xf32>
    %17 = vector.shape_cast %16 : vector<8xf32> to vector<8x1xf32>
    %cst_25 = arith.constant 3.200000e+01 : f32
    %18 = vector.broadcast %cst_25 : f32 to vector<8x1xf32>
    %19 = arith.divf %17, %18 : vector<8x1xf32>
    %20 = vector.broadcast %19 : vector<8x1xf32> to vector<8x32xf32>
    %21 = arith.subf %13, %20 : vector<8x32xf32>
    %22 = arith.mulf %21, %21 : vector<8x32xf32>
    %cst_26 = arith.constant dense<0.000000e+00> : vector<8xf32>
    %23 = vector.multi_reduction <add>, %22, %cst_26 [1] : vector<8x32xf32> to vector<8xf32>
    %24 = vector.shape_cast %23 : vector<8xf32> to vector<8x1xf32>
    %cst_27 = arith.constant 0.0322580636 : f32
    %25 = vector.broadcast %cst_27 : f32 to vector<8x1xf32>
    %26 = arith.mulf %24, %25 : vector<8x1xf32>
    %27 = math.sqrt %26 : vector<8x1xf32>
    %cst_28 = arith.constant 9.99999997E-7 : f32
    %28 = vector.broadcast %cst_28 : f32 to vector<8x1xf32>
    %29 = arith.addf %27, %28 : vector<8x1xf32>
    %30 = tpu.reciprocal %29 : vector<8x1xf32> -> vector<8x1xf32>
    %31 = vector.broadcast %19 : vector<8x1xf32> to vector<8x32xf32>
    %32 = arith.subf %13, %31 : vector<8x32xf32>
    %33 = vector.broadcast %0 : vector<1x32xf32> to vector<8x32xf32>
    %34 = arith.mulf %33, %32 : vector<8x32xf32>
    %35 = vector.broadcast %30 : vector<8x1xf32> to vector<8x32xf32>
    %36 = arith.mulf %34, %35 : vector<8x32xf32>
    %37 = vector.broadcast %1 : vector<1x32xf32> to vector<8x32xf32>
    %38 = arith.addf %36, %37 : vector<8x32xf32>
    %39 = vector.shape_cast %38 : vector<8x32xf32> to vector<1x8x32xf32>
    %40 = vector.shape_cast %39 : vector<1x8x32xf32> to vector<1x8x32xf32>
    %41 = vector.broadcast %40 : vector<1x8x32xf32> to vector<12x8x32xf32>
    "tpu.trace_start"() <{level = 10 : i32, message = "jsd,jdk->jsk"}> : () -> ()
    %cst_29 = arith.constant dense<0.000000e+00> : vector<12x8x8xf32>
    %42 = tpu.matmul %41, %7, %cst_29 {dimension_numbers = #tpu.dot_dimension_numbers<[2], [1], [1], [2], [0, 0, 0, 1, 1, 2], [0], [0]>} : vector<12x8x32xf32>, vector<12x32x8xf32>, vector<12x8x8xf32> -> vector<12x8x8xf32>
    "tpu.trace_stop"() : () -> ()
    %43 = vector.broadcast %8 : vector<12x1x8xf32> to vector<12x8x8xf32>
    %44 = arith.addf %42, %43 : vector<12x8x8xf32>
    %45 = vector.extract_strided_slice %44 {offsets = [0, 0, 0], sizes = [4, 8, 8], strides = [1, 1, 1]} : vector<12x8x8xf32> to vector<4x8x8xf32>
    %46 = vector.extract_strided_slice %44 {offsets = [4, 0, 0], sizes = [4, 8, 8], strides = [1, 1, 1]} : vector<12x8x8xf32> to vector<4x8x8xf32>
    %47 = vector.extract_strided_slice %44 {offsets = [8, 0, 0], sizes = [4, 8, 8], strides = [1, 1, 1]} : vector<12x8x8xf32> to vector<4x8x8xf32>
    "tpu.trace_start"() <{level = 10 : i32, message = "hqd,hkd->hqk"}> : () -> ()
    %cst_30 = arith.constant dense<0.000000e+00> : vector<4x8x8xf32>
    %48 = tpu.matmul %45, %46, %cst_30 {dimension_numbers = #tpu.dot_dimension_numbers<[2], [2], [1], [1], [0, 0, 0, 1, 1, 1], [0], [0]>} : vector<4x8x8xf32>, vector<4x8x8xf32>, vector<4x8x8xf32> -> vector<4x8x8xf32>
    "tpu.trace_stop"() : () -> ()
    %cst_31 = arith.constant 0.353553385 : f32
    %49 = vector.broadcast %cst_31 : f32 to vector<4x8x8xf32>
    %50 = arith.mulf %48, %49 : vector<4x8x8xf32>
    %51 = vector.shape_cast %15 : vector<8x8xf32> to vector<1x8x8xf32>
    %cst_32 = arith.constant 0.000000e+00 : f32
    %52 = vector.broadcast %cst_32 : f32 to vector<1x8x8xf32>
    %53 = arith.cmpf oeq, %51, %52 : vector<1x8x8xf32>
    %cst_33 = arith.constant -1.000000e+09 : f32
    %54 = vector.shape_cast %53 : vector<1x8x8xi1> to vector<1x8x8xi1>
    %55 = vector.broadcast %54 : vector<1x8x8xi1> to vector<4x8x8xi1>
    %56 = vector.broadcast %cst_33 : f32 to vector<4x8x8xf32>
    %57 = arith.select %55, %56, %50 : vector<4x8x8xi1>, vector<4x8x8xf32>
    %cst_34 = arith.constant dense<0xFF800000> : vector<4x8xf32>
    %58 = vector.multi_reduction <maximumf>, %57, %cst_34 [2] : vector<4x8x8xf32> to vector<4x8xf32>
    %59 = vector.shape_cast %58 : vector<4x8xf32> to vector<4x8x1xf32>
    %60 = vector.broadcast %59 : vector<4x8x1xf32> to vector<4x8x8xf32>
    %61 = arith.subf %57, %60 : vector<4x8x8xf32>
    %62 = math.exp %61 : vector<4x8x8xf32>
    %cst_35 = arith.constant dense<0.000000e+00> : vector<4x8xf32>
    %63 = vector.multi_reduction <add>, %62, %cst_35 [2] : vector<4x8x8xf32> to vector<4x8xf32>
    %64 = vector.shape_cast %63 : vector<4x8xf32> to vector<4x8x1xf32>
    %65 = tpu.reciprocal %64 : vector<4x8x1xf32> -> vector<4x8x1xf32>
    %66 = vector.broadcast %65 : vector<4x8x1xf32> to vector<4x8x8xf32>
    %67 = arith.mulf %62, %66 : vector<4x8x8xf32>
    "tpu.trace_start"() <{level = 10 : i32, message = "hqk,hkd->hqd"}> : () -> ()
    %cst_36 = arith.constant dense<0.000000e+00> : vector<4x8x8xf32>
    %68 = tpu.matmul %67, %47, %cst_36 {dimension_numbers = #tpu.dot_dimension_numbers<[2], [1], [1], [2], [0, 0, 0, 1, 1, 2], [0], [0]>} : vector<4x8x8xf32>, vector<4x8x8xf32>, vector<4x8x8xf32> -> vector<4x8x8xf32>
    "tpu.trace_stop"() : () -> ()
    "tpu.trace_start"() <{level = 10 : i32, message = "hqd,hdm->hqm"}> : () -> ()
    %cst_37 = arith.constant dense<0.000000e+00> : vector<4x8x32xf32>
    %69 = tpu.matmul %68, %9, %cst_37 {dimension_numbers = #tpu.dot_dimension_numbers<[2], [1], [1], [2], [0, 0, 0, 1, 1, 2], [0], [0]>} : vector<4x8x8xf32>, vector<4x8x32xf32>, vector<4x8x32xf32> -> vector<4x8x32xf32>
    "tpu.trace_stop"() : () -> ()
    %cst_38 = arith.constant dense<0.000000e+00> : vector<8x32xf32>
    %70 = vector.multi_reduction <add>, %69, %cst_38 [0] : vector<4x8x32xf32> to vector<8x32xf32>
    %71 = vector.broadcast %4 : vector<1x32xf32> to vector<8x32xf32>
    %72 = arith.addf %70, %71 : vector<8x32xf32>
    %73 = arith.addf %13, %72 : vector<8x32xf32>
    %cst_39 = arith.constant dense<0.000000e+00> : vector<8xf32>
    %74 = vector.multi_reduction <add>, %73, %cst_39 [1] : vector<8x32xf32> to vector<8xf32>
    %75 = vector.shape_cast %74 : vector<8xf32> to vector<8x1xf32>
    %cst_40 = arith.constant 3.200000e+01 : f32
    %76 = vector.broadcast %cst_40 : f32 to vector<8x1xf32>
    %77 = arith.divf %75, %76 : vector<8x1xf32>
    %78 = vector.broadcast %77 : vector<8x1xf32> to vector<8x32xf32>
    %79 = arith.subf %73, %78 : vector<8x32xf32>
    %80 = arith.mulf %79, %79 : vector<8x32xf32>
    %cst_41 = arith.constant dense<0.000000e+00> : vector<8xf32>
    %81 = vector.multi_reduction <add>, %80, %cst_41 [1] : vector<8x32xf32> to vector<8xf32>
    %82 = vector.shape_cast %81 : vector<8xf32> to vector<8x1xf32>
    %cst_42 = arith.constant 0.0322580636 : f32
    %83 = vector.broadcast %cst_42 : f32 to vector<8x1xf32>
    %84 = arith.mulf %82, %83 : vector<8x1xf32>
    %85 = math.sqrt %84 : vector<8x1xf32>
    %cst_43 = arith.constant 9.99999997E-7 : f32
    %86 = vector.broadcast %cst_43 : f32 to vector<8x1xf32>
    %87 = arith.addf %85, %86 : vector<8x1xf32>
    %88 = tpu.reciprocal %87 : vector<8x1xf32> -> vector<8x1xf32>
    %89 = vector.broadcast %77 : vector<8x1xf32> to vector<8x32xf32>
    %90 = arith.subf %73, %89 : vector<8x32xf32>
    %91 = vector.broadcast %2 : vector<1x32xf32> to vector<8x32xf32>
    %92 = arith.mulf %91, %90 : vector<8x32xf32>
    %93 = vector.broadcast %88 : vector<8x1xf32> to vector<8x32xf32>
    %94 = arith.mulf %92, %93 : vector<8x32xf32>
    %95 = vector.broadcast %3 : vector<1x32xf32> to vector<8x32xf32>
    %96 = arith.addf %94, %95 : vector<8x32xf32>
    %cst_44 = arith.constant dense<0.000000e+00> : vector<8x64xf32>
    %97 = tpu.matmul %96, %10, %cst_44 {dimension_numbers = #tpu.dot_dimension_numbers<[1], [0], [0], [1], [0, 0, 1, 1], [], []>} : vector<8x32xf32>, vector<32x64xf32>, vector<8x64xf32> -> vector<8x64xf32>
    %98 = vector.broadcast %6 : vector<1x64xf32> to vector<8x64xf32>
    %99 = arith.addf %97, %98 : vector<8x64xf32>
    %cst_45 = arith.constant 0.000000e+00 : f32
    %100 = vector.broadcast %cst_45 : f32 to vector<8x64xf32>
    %101 = arith.maximumf %99, %100 : vector<8x64xf32>
    %cst_46 = arith.constant dense<0.000000e+00> : vector<8x32xf32>
    %102 = tpu.matmul %101, %11, %cst_46 {dimension_numbers = #tpu.dot_dimension_numbers<[1], [0], [0], [1], [0, 0, 1, 1], [], []>} : vector<8x64xf32>, vector<64x32xf32>, vector<8x32xf32> -> vector<8x32xf32>
    %103 = vector.broadcast %5 : vector<1x32xf32> to vector<8x32xf32>
    %104 = arith.addf %102, %103 : vector<8x32xf32>
    %105 = arith.addf %73, %104 : vector<8x32xf32>
    %c0_47 = arith.constant 0 : index
    %c0_48 = arith.constant 0 : index
    %c0_49 = arith.constant 0 : index
    %106 = vector.load %arg8[%c0_47, %c0_48, %c0_49] : memref<2x8x32xf32, #tpu.memory_space<vmem>>, vector<1x8x32xf32>
    %107 = vector.shape_cast %106 : vector<1x8x32xf32> to vector<8x32xf32>
    %108 = vector.shape_cast %105 : vector<8x32xf32> to vector<1x8x32xf32>
    tpu.vector_store %arg8[%c0_47, %c0_48, %c0_49], %108 {strides = array<i32>} : memref<2x8x32xf32, #tpu.memory_space<vmem>>, vector<1x8x32xf32>,
    %c1_50 = arith.constant 1 : index
    %c0_51 = arith.constant 0 : index
    %c0_52 = arith.constant 0 : index
    %109 = vector.load %arg1[%c1_50, %c0_51, %c0_52] : memref<2x8x32xf32, #tpu.memory_space<vmem>>, vector<1x8x32xf32>
    %110 = vector.shape_cast %109 : vector<1x8x32xf32> to vector<8x32xf32>
    %c1_53 = arith.constant 1 : index
    %c0_54 = arith.constant 0 : index
    %c0_55 = arith.constant 0 : index
    %111 = vector.load %arg2[%c1_53, %c0_54, %c0_55] : memref<2x8x8xf32, #tpu.memory_space<vmem>>, vector<1x8x8xf32>
    %112 = vector.shape_cast %111 : vector<1x8x8xf32> to vector<8x8xf32>
    %cst_56 = arith.constant dense<0.000000e+00> : vector<8xf32>
    %113 = vector.multi_reduction <add>, %110, %cst_56 [1] : vector<8x32xf32> to vector<8xf32>
    %114 = vector.shape_cast %113 : vector<8xf32> to vector<8x1xf32>
    %cst_57 = arith.constant 3.200000e+01 : f32
    %115 = vector.broadcast %cst_57 : f32 to vector<8x1xf32>
    %116 = arith.divf %114, %115 : vector<8x1xf32>
    %117 = vector.broadcast %116 : vector<8x1xf32> to vector<8x32xf32>
    %118 = arith.subf %110, %117 : vector<8x32xf32>
    %119 = arith.mulf %118, %118 : vector<8x32xf32>
    %cst_58 = arith.constant dense<0.000000e+00> : vector<8xf32>
    %120 = vector.multi_reduction <add>, %119, %cst_58 [1] : vector<8x32xf32> to vector<8xf32>
    %121 = vector.shape_cast %120 : vector<8xf32> to vector<8x1xf32>
    %cst_59 = arith.constant 0.0322580636 : f32
    %122 = vector.broadcast %cst_59 : f32 to vector<8x1xf32>
    %123 = arith.mulf %121, %122 : vector<8x1xf32>
    %124 = math.sqrt %123 : vector<8x1xf32>
    %cst_60 = arith.constant 9.99999997E-7 : f32
    %125 = vector.broadcast %cst_60 : f32 to vector<8x1xf32>
    %126 = arith.addf %124, %125 : vector<8x1xf32>
    %127 = tpu.reciprocal %126 : vector<8x1xf32> -> vector<8x1xf32>
    %128 = vector.broadcast %116 : vector<8x1xf32> to vector<8x32xf32>
    %129 = arith.subf %110, %128 : vector<8x32xf32>
    %130 = vector.broadcast %0 : vector<1x32xf32> to vector<8x32xf32>
    %131 = arith.mulf %130, %129 : vector<8x32xf32>
    %132 = vector.broadcast %127 : vector<8x1xf32> to vector<8x32xf32>
    %133 = arith.mulf %131, %132 : vector<8x32xf32>
    %134 = vector.broadcast %1 : vector<1x32xf32> to vector<8x32xf32>
    %135 = arith.addf %133, %134 : vector<8x32xf32>
    %136 = vector.shape_cast %135 : vector<8x32xf32> to vector<1x8x32xf32>
    %137 = vector.shape_cast %136 : vector<1x8x32xf32> to vector<1x8x32xf32>
    %138 = vector.broadcast %137 : vector<1x8x32xf32> to vector<12x8x32xf32>
    "tpu.trace_start"() <{level = 10 : i32, message = "jsd,jdk->jsk"}> : () -> ()
    %cst_61 = arith.constant dense<0.000000e+00> : vector<12x8x8xf32>
    %139 = tpu.matmul %138, %7, %cst_61 {dimension_numbers = #tpu.dot_dimension_numbers<[2], [1], [1], [2], [0, 0, 0, 1, 1, 2], [0], [0]>} : vector<12x8x32xf32>, vector<12x32x8xf32>, vector<12x8x8xf32> -> vector<12x8x8xf32>
    "tpu.trace_stop"() : () -> ()
    %140 = vector.broadcast %8 : vector<12x1x8xf32> to vector<12x8x8xf32>
    %141 = arith.addf %139, %140 : vector<12x8x8xf32>
    %142 = vector.extract_strided_slice %141 {offsets = [0, 0, 0], sizes = [4, 8, 8], strides = [1, 1, 1]} : vector<12x8x8xf32> to vector<4x8x8xf32>
    %143 = vector.extract_strided_slice %141 {offsets = [4, 0, 0], sizes = [4, 8, 8], strides = [1, 1, 1]} : vector<12x8x8xf32> to vector<4x8x8xf32>
    %144 = vector.extract_strided_slice %141 {offsets = [8, 0, 0], sizes = [4, 8, 8], strides = [1, 1, 1]} : vector<12x8x8xf32> to vector<4x8x8xf32>
    "tpu.trace_start"() <{level = 10 : i32, message = "hqd,hkd->hqk"}> : () -> ()
    %cst_62 = arith.constant dense<0.000000e+00> : vector<4x8x8xf32>
    %145 = tpu.matmul %142, %143, %cst_62 {dimension_numbers = #tpu.dot_dimension_numbers<[2], [2], [1], [1], [0, 0, 0, 1, 1, 1], [0], [0]>} : vector<4x8x8xf32>, vector<4x8x8xf32>, vector<4x8x8xf32> -> vector<4x8x8xf32>
    "tpu.trace_stop"() : () -> ()
    %cst_63 = arith.constant 0.353553385 : f32
    %146 = vector.broadcast %cst_63 : f32 to vector<4x8x8xf32>
    %147 = arith.mulf %145, %146 : vector<4x8x8xf32>
    %148 = vector.shape_cast %112 : vector<8x8xf32> to vector<1x8x8xf32>
    %cst_64 = arith.constant 0.000000e+00 : f32
    %149 = vector.broadcast %cst_64 : f32 to vector<1x8x8xf32>
    %150 = arith.cmpf oeq, %148, %149 : vector<1x8x8xf32>
    %cst_65 = arith.constant -1.000000e+09 : f32
    %151 = vector.shape_cast %150 : vector<1x8x8xi1> to vector<1x8x8xi1>
    %152 = vector.broadcast %151 : vector<1x8x8xi1> to vector<4x8x8xi1>
    %153 = vector.broadcast %cst_65 : f32 to vector<4x8x8xf32>
    %154 = arith.select %152, %153, %147 : vector<4x8x8xi1>, vector<4x8x8xf32>
    %cst_66 = arith.constant dense<0xFF800000> : vector<4x8xf32>
    %155 = vector.multi_reduction <maximumf>, %154, %cst_66 [2] : vector<4x8x8xf32> to vector<4x8xf32>
    %156 = vector.shape_cast %155 : vector<4x8xf32> to vector<4x8x1xf32>
    %157 = vector.broadcast %156 : vector<4x8x1xf32> to vector<4x8x8xf32>
    %158 = arith.subf %154, %157 : vector<4x8x8xf32>
    %159 = math.exp %158 : vector<4x8x8xf32>
    %cst_67 = arith.constant dense<0.000000e+00> : vector<4x8xf32>
    %160 = vector.multi_reduction <add>, %159, %cst_67 [2] : vector<4x8x8xf32> to vector<4x8xf32>
    %161 = vector.shape_cast %160 : vector<4x8xf32> to vector<4x8x1xf32>
    %162 = tpu.reciprocal %161 : vector<4x8x1xf32> -> vector<4x8x1xf32>
    %163 = vector.broadcast %162 : vector<4x8x1xf32> to vector<4x8x8xf32>
    %164 = arith.mulf %159, %163 : vector<4x8x8xf32>
    "tpu.trace_start"() <{level = 10 : i32, message = "hqk,hkd->hqd"}> : () -> ()
    %cst_68 = arith.constant dense<0.000000e+00> : vector<4x8x8xf32>
    %165 = tpu.matmul %164, %144, %cst_68 {dimension_numbers = #tpu.dot_dimension_numbers<[2], [1], [1], [2], [0, 0, 0, 1, 1, 2], [0], [0]>} : vector<4x8x8xf32>, vector<4x8x8xf32>, vector<4x8x8xf32> -> vector<4x8x8xf32>
    "tpu.trace_stop"() : () -> ()
    "tpu.trace_start"() <{level = 10 : i32, message = "hqd,hdm->hqm"}> : () -> ()
    %cst_69 = arith.constant dense<0.000000e+00> : vector<4x8x32xf32>
    %166 = tpu.matmul %165, %9, %cst_69 {dimension_numbers = #tpu.dot_dimension_numbers<[2], [1], [1], [2], [0, 0, 0, 1, 1, 2], [0], [0]>} : vector<4x8x8xf32>, vector<4x8x32xf32>, vector<4x8x32xf32> -> vector<4x8x32xf32>
    "tpu.trace_stop"() : () -> ()
    %cst_70 = arith.constant dense<0.000000e+00> : vector<8x32xf32>
    %167 = vector.multi_reduction <add>, %166, %cst_70 [0] : vector<4x8x32xf32> to vector<8x32xf32>
    %168 = vector.broadcast %4 : vector<1x32xf32> to vector<8x32xf32>
    %169 = arith.addf %167, %168 : vector<8x32xf32>
    %170 = arith.addf %110, %169 : vector<8x32xf32>
    %cst_71 = arith.constant dense<0.000000e+00> : vector<8xf32>
    %171 = vector.multi_reduction <add>, %170, %cst_71 [1] : vector<8x32xf32> to vector<8xf32>
    %172 = vector.shape_cast %171 : vector<8xf32> to vector<8x1xf32>
    %cst_72 = arith.constant 3.200000e+01 : f32
    %173 = vector.broadcast %cst_72 : f32 to vector<8x1xf32>
    %174 = arith.divf %172, %173 : vector<8x1xf32>
    %175 = vector.broadcast %174 : vector<8x1xf32> to vector<8x32xf32>
    %176 = arith.subf %170, %175 : vector<8x32xf32>
    %177 = arith.mulf %176, %176 : vector<8x32xf32>
    %cst_73 = arith.constant dense<0.000000e+00> : vector<8xf32>
    %178 = vector.multi_reduction <add>, %177, %cst_73 [1] : vector<8x32xf32> to vector<8xf32>
    %179 = vector.shape_cast %178 : vector<8xf32> to vector<8x1xf32>
    %cst_74 = arith.constant 0.0322580636 : f32
    %180 = vector.broadcast %cst_74 : f32 to vector<8x1xf32>
    %181 = arith.mulf %179, %180 : vector<8x1xf32>
    %182 = math.sqrt %181 : vector<8x1xf32>
    %cst_75 = arith.constant 9.99999997E-7 : f32
    %183 = vector.broadcast %cst_75 : f32 to vector<8x1xf32>
    %184 = arith.addf %182, %183 : vector<8x1xf32>
    %185 = tpu.reciprocal %184 : vector<8x1xf32> -> vector<8x1xf32>
    %186 = vector.broadcast %174 : vector<8x1xf32> to vector<8x32xf32>
    %187 = arith.subf %170, %186 : vector<8x32xf32>
    %188 = vector.broadcast %2 : vector<1x32xf32> to vector<8x32xf32>
    %189 = arith.mulf %188, %187 : vector<8x32xf32>
    %190 = vector.broadcast %185 : vector<8x1xf32> to vector<8x32xf32>
    %191 = arith.mulf %189, %190 : vector<8x32xf32>
    %192 = vector.broadcast %3 : vector<1x32xf32> to vector<8x32xf32>
    %193 = arith.addf %191, %192 : vector<8x32xf32>
    %cst_76 = arith.constant dense<0.000000e+00> : vector<8x64xf32>
    %194 = tpu.matmul %193, %10, %cst_76 {dimension_numbers = #tpu.dot_dimension_numbers<[1], [0], [0], [1], [0, 0, 1, 1], [], []>} : vector<8x32xf32>, vector<32x64xf32>, vector<8x64xf32> -> vector<8x64xf32>
    %195 = vector.broadcast %6 : vector<1x64xf32> to vector<8x64xf32>
    %196 = arith.addf %194, %195 : vector<8x64xf32>
    %cst_77 = arith.constant 0.000000e+00 : f32
    %197 = vector.broadcast %cst_77 : f32 to vector<8x64xf32>
    %198 = arith.maximumf %196, %197 : vector<8x64xf32>
    %cst_78 = arith.constant dense<0.000000e+00> : vector<8x32xf32>
    %199 = tpu.matmul %198, %11, %cst_78 {dimension_numbers = #tpu.dot_dimension_numbers<[1], [0], [0], [1], [0, 0, 1, 1], [], []>} : vector<8x64xf32>, vector<64x32xf32>, vector<8x32xf32> -> vector<8x32xf32>
    %200 = vector.broadcast %5 : vector<1x32xf32> to vector<8x32xf32>
    %201 = arith.addf %199, %200 : vector<8x32xf32>
    %202 = arith.addf %170, %201 : vector<8x32xf32>
    %c1_79 = arith.constant 1 : index
    %c0_80 = arith.constant 0 : index
    %c0_81 = arith.constant 0 : index
    %203 = vector.load %arg8[%c1_79, %c0_80, %c0_81] : memref<2x8x32xf32, #tpu.memory_space<vmem>>, vector<1x8x32xf32>
    %204 = vector.shape_cast %203 : vector<1x8x32xf32> to vector<8x32xf32>
    %205 = vector.shape_cast %202 : vector<8x32xf32> to vector<1x8x32xf32>
    tpu.vector_store %arg8[%c1_79, %c0_80, %c0_81], %205 {strides = array<i32>} : memref<2x8x32xf32, #tpu.memory_space<vmem>>, vector<1x8x32xf32>,
    return
  }
  func.func @transform_0(%arg0: i32) -> (i32, i32, i32) {
    %c0_i32 = arith.constant 0 : i32
    %c0_i32_0 = arith.constant 0 : i32
    %c0_i32_1 = arith.constant 0 : i32
    return %arg0, %c0_i32, %c0_i32_0 : i32, i32, i32
  }
  func.func @transform_1(%arg0: i32) -> (i32, i32, i32) {
    %c0_i32 = arith.constant 0 : i32
    %c0_i32_0 = arith.constant 0 : i32
    %c0_i32_1 = arith.constant 0 : i32
    return %arg0, %c0_i32, %c0_i32_0 : i32, i32, i32
  }
  func.func @transform_2(%arg0: i32) -> (i32, i32, i32) {
    %c0_i32 = arith.constant 0 : i32
    %c0_i32_0 = arith.constant 0 : i32
    %c0_i32_1 = arith.constant 0 : i32
    %c0_i32_2 = arith.constant 0 : i32
    return %c0_i32, %c0_i32_0, %c0_i32_1 : i32, i32, i32
  }
  func.func @transform_3(%arg0: i32) -> (i32, i32, i32) {
    %c0_i32 = arith.constant 0 : i32
    %c0_i32_0 = arith.constant 0 : i32
    %c0_i32_1 = arith.constant 0 : i32
    %c0_i32_2 = arith.constant 0 : i32
    return %c0_i32, %c0_i32_0, %c0_i32_1 : i32, i32, i32
  }
  func.func @transform_4(%arg0: i32) -> (i32, i32, i32) {
    %c0_i32 = arith.constant 0 : i32
    %c0_i32_0 = arith.constant 0 : i32
    %c0_i32_1 = arith.constant 0 : i32
    %c0_i32_2 = arith.constant 0 : i32
    return %c0_i32, %c0_i32_0, %c0_i32_1 : i32, i32, i32
  }
  func.func @transform_5(%arg0: i32) -> (i32, i32) {
    %c0_i32 = arith.constant 0 : i32
    %c0_i32_0 = arith.constant 0 : i32
    %c0_i32_1 = arith.constant 0 : i32
    return %c0_i32, %c0_i32_0 : i32, i32
  }
  func.func @transform_6(%arg0: i32) -> (i32, i32) {
    %c0_i32 = arith.constant 0 : i32
    %c0_i32_0 = arith.constant 0 : i32
    %c0_i32_1 = arith.constant 0 : i32
    return %c0_i32, %c0_i32_0 : i32, i32
  }
  func.func @transform_7(%arg0: i32) -> (i32, i32, i32) {
    %c0_i32 = arith.constant 0 : i32
    %c0_i32_0 = arith.constant 0 : i32
    %c0_i32_1 = arith.constant 0 : i32
    return %arg0, %c0_i32, %c0_i32_0 : i32, i32, i32
  }
}

</mosaic_0001>

<bundles_post_ra>
// kernel: tpu_custom_call.1
= control target key start
LH: loop header
LB: loop body
LE: loop exit
PB: predicated region body
PF: predicated region fallthrough
CT: control target
= control target key end

     0   :  { %vm112_vm0 = vcmask 261120   ;;  %s6074_s0 = inlined_call_operand.vmem [shape: f32[2,8,32], index: 0, kind: input, shape index: {}]   ;;  %s6075_s1 = inlined_call_operand.vmem [shape: f32[2,8,8], index: 1, kind: input, shape index: {}]   ;;  %s6076_s2 = inlined_call_operand.vmem [shape: f32[12,32,8], index: 2, kind: input, shape index: {}]   ;;  %s6077_s3 = inlined_call_operand.vmem [shape: f32[12,1,8], index: 3, kind: input, shape index: {}]   ;;  %s6078_s4 = inlined_call_operand.vmem [shape: f32[4,8,32], index: 4, kind: input, shape index: {}]   ;;  %s6079_s5 = inlined_call_operand.vmem [shape: f32[96,64], index: 5, kind: input, shape index: {}]   ;;  %s6080_s6 = inlined_call_operand.vmem [shape: f32[8,64], index: 6, kind: input, shape index: {}]   ;;  %s6081_s7 = inlined_call_operand.hbm [shape: f32[2,8,32], index: 7, kind: output, shape index: {}]  }
   0x1   :  { %v5057_v0 = vld [vmem:[%s6074_s0] sm:$0xff] }
   0x2   :  { %12 = vsyncpa [#allocation3], 0  ;;  %v113_v1 = vsel %vm112_vm0, %v5057_v0, 0.0  ;;  %v6082_v7 = vmov 0.0   ;;  %v5068_v8 = vld [vmem:[%s6076_s2 + $0x18] sm:$0xff]  ;;  %v5082_v10 = vld [vmem:[%s6076_s2 + $0x10] sm:$0xff] }
   0x3   :  { %114 = vadd.xlane.f32.xlu0 %v113_v1  ;;  %4490 = vmatprep.subr.mxu0 %v6082_v7  ;;  %v5073_v9 = vld [vmem:[%s6076_s2 + $0x38] sm:$0xff]  ;;  %v5087_v11 = vld [vmem:[%s6076_s2 + $0x30] sm:$0xff]  ;;  %v5096_v12 = vld [vmem:[%s6076_s2 + $0x8] sm:$0xff]  ;;  %vm5010_vm1 = vmmov 0   ;;  %vm1059_vm4 = vcmask 64512   ;;  %vm2128_vm10 = vcmask 523264  }
   0x4   :  { %4501 = vmatprep.subr.mxu1 %v6082_v7  ;;  %4491 = vmatpush3.msra.mxu0 %v5068_v8  ;;  %v5101_v13 = vld [vmem:[%s6076_s2 + $0x28] sm:$0xff]  ;;  %v5110_v14 = vld [vmem:[%s6076_s2] sm:$0xff]  ;;  %v5142_v30 = vld [vmem:[%s6076_s2 + $0x58] sm:$0xff] }
   0x5   :  { %4502 = vmatpush3.msra.mxu1 %v5073_v9  ;;  %4492 = vmatprep.subr.mxu0 %v6082_v7  ;;  %v5115_v15 = vld [vmem:[%s6076_s2 + $0x20] sm:$0xff]  ;;  %v5147_v31 = vld [vmem:[%s6076_s2 + $0x78] sm:$0xff]  ;;  %v5156_v32 = vld [vmem:[%s6076_s2 + $0x50] sm:$0xff] }
   0x6   :  { %4503 = vmatprep.subr.mxu1 %v6082_v7  ;;  %4493 = vmatpush3.msra.mxu0 %v5082_v10  ;;  %v5128_v24 = vld [vmem:[%s6080_s6] ss:$0 sm:$0xff]  ;;  %v5134_v27 = vld [vmem:[%s6080_s6 + $0x1] ss:$0 sm:$0xff]  ;;  %v5161_v33 = vld [vmem:[%s6076_s2 + $0x70] sm:$0xff] }
   0x7   :  { %4504 = vmatpush3.msra.mxu1 %v5087_v11  ;;  %4494 = vmatprep.subr.mxu0 %v6082_v7  ;;  %v5170_v34 = vld [vmem:[%s6076_s2 + $0x48] sm:$0xff]  ;;  %v5184_v36 = vld [vmem:[%s6076_s2 + $0x40] sm:$0xff]  ;;  %v5204_v38 = vld [vmem:[%s6076_s2 + $0x98] sm:$0xff] }
   0x8   :  { %4505 = vmatprep.subr.mxu1 %v6082_v7  ;;  %4495 = vmatpush3.msra.mxu0 %v5096_v12  ;;  %v5175_v35 = vld [vmem:[%s6076_s2 + $0x68] sm:$0xff]  ;;  %v5191_v37 = vld [vmem:[%s6076_s2 + $0x60] sm:$0xff]  ;;  %v5209_v39 = vld [vmem:[%s6076_s2 + $0xb8] sm:$0xff] }
   0x9   :  { %4506 = vmatpush3.msra.mxu1 %v5101_v13  ;;  %4496 = vmatprep.subr.mxu0 %v6082_v7  ;;  %v5220_v40 = vld [vmem:[%s6076_s2 + $0x90] sm:$0xff]  ;;  %v5234_v42 = vld [vmem:[%s6076_s2 + $0x88] sm:$0xff]  ;;  %v5248_v44 = vld [vmem:[%s6076_s2 + $0x80] sm:$0xff] }
   0xa   :  { %4507 = vmatprep.subr.mxu1 %v6082_v7  ;;  %4497 = vmatpush3.msra.mxu0 %v5110_v14  ;;  %v5225_v41 = vld [vmem:[%s6076_s2 + $0xb0] sm:$0xff]  ;;  %v5239_v43 = vld [vmem:[%s6076_s2 + $0xa8] sm:$0xff]  ;;  %v5255_v45 = vld [vmem:[%s6076_s2 + $0xa0] sm:$0xff] }
   0xb   :  { %4508 = vmatpush3.msra.mxu1 %v5115_v15  ;;  %4498 = vmatprep.mubr.msk.f32.mxu0 %vm5010_vm1, %v6082_v7  ;;  %v5268_v46 = vld [vmem:[%s6076_s2 + $0xd8] sm:$0xff]  ;;  %v5284_v48 = vld [vmem:[%s6076_s2 + $0xd0] sm:$0xff]  ;;  %v5298_v50 = vld [vmem:[%s6076_s2 + $0xc8] sm:$0xff] }
   0xc   :  { %4509 = vmatprep.mubr.msk.f32.mxu1 %vm5010_vm1, %v6082_v7  ;;  %4512 = vmatprep.subr.mxu0 %v6082_v7  ;;  %v5273_v47 = vld [vmem:[%s6076_s2 + $0xf8] sm:$0xff]  ;;  %v5289_v49 = vld [vmem:[%s6076_s2 + $0xf0] sm:$0xff]  ;;  %v5303_v51 = vld [vmem:[%s6076_s2 + $0xe8] sm:$0xff] }
   0xd   :  { %4523 = vmatprep.subr.mxu1 %v6082_v7  ;;  %v5312_v52 = vld [vmem:[%s6076_s2 + $0xc0] sm:$0xff]  ;;  %v5332_v54 = vld [vmem:[%s6076_s2 + $0x118] sm:$0xff]  ;;  %v5348_v56 = vld [vmem:[%s6076_s2 + $0x110] sm:$0xff] }
   0xe   :  { %6117 = vst [vmem:[#allocation5_spill] sm:$0xff] %v5312_v52  ;;  %v5319_v53 = vld [vmem:[%s6076_s2 + $0xe0] sm:$0xff]  ;;  %6118 = vst [vmem:[#allocation6_spill] sm:$0xff] %v5332_v54  ;;  %v5337_v55 = vld [vmem:[%s6076_s2 + $0x138] sm:$0xff] }
   0xf   :  { %6119 = vst [vmem:[#allocation7_spill] sm:$0xff] %v5348_v56  ;;  %v5353_v57 = vld [vmem:[%s6076_s2 + $0x130] sm:$0xff]  ;;  %v5362_v58 = vld [vmem:[%s6076_s2 + $0x108] sm:$0xff]  ;;  %v5376_v60 = vld [vmem:[%s6076_s2 + $0x100] sm:$0xff] }
  0x10   :  { %6120 = vst [vmem:[#allocation8_spill] sm:$0xff] %v5362_v58  ;;  %v5367_v59 = vld [vmem:[%s6076_s2 + $0x128] sm:$0xff]  ;;  %6121 = vst [vmem:[#allocation9_spill] sm:$0xff] %v5376_v60  ;;  %v5383_v61 = vld [vmem:[%s6076_s2 + $0x120] sm:$0xff] }
  0x11   :  { %v5396_v62 = vld [vmem:[%s6076_s2 + $0x158] sm:$0xff]  ;;  %v5412_v1 = vld [vmem:[%s6076_s2 + $0x150] sm:$0xff] }
  0x12   :  { %6122 = vst [vmem:[#allocation10_spill] sm:$0xff] %v5396_v62  ;;  %v5401_v63 = vld [vmem:[%s6076_s2 + $0x178] sm:$0xff]  ;;  %6123 = vst [vmem:[#allocation11_spill] sm:$0xff] %v5412_v1 }
  0x8c   :  { %v115_v2 = vpop.xlane.xlu0 %114 }
  0x8d   :  { %v117_v3 = vmul.f32 0.03125, %v115_v2  ;;  %v5417_v2 = vld [vmem:[%s6076_s2 + $0x170] sm:$0xff] }
  0x8f   :  { %v118_v4 = vsub.f32 %v5057_v0, %v117_v3  ;;  %v5426_v3 = vld [vmem:[%s6076_s2 + $0x148] sm:$0xff] }
  0x90   :  { %6124 = vst [vmem:[#allocation12_spill] sm:$0xff] %v5426_v3 }
  0x91   :  { %v119_v5 = vmul.f32 %v118_v4, %v118_v4  ;;  %v137_v25 = vmul.f32 %v5128_v24, %v118_v4  ;;  %v5431_v4 = vld [vmem:[%s6076_s2 + $0x168] sm:$0xff] }
  0x93   :  { %v120_v6 = vsel %vm112_vm0, %v119_v5, 0.0  ;;  %v5440_v5 = vld [vmem:[%s6076_s2 + $0x140] sm:$0xff] }
  0x94   :  { %121 = vadd.xlane.f32.xlu0 %v120_v6  ;;  %6125 = vst [vmem:[#allocation13_spill] sm:$0xff] %v5440_v5  ;;  %v5447_v6 = vld [vmem:[%s6076_s2 + $0x160] sm:$0xff] }
 0x11d   :  { %v122_v16 = vpop.xlane.xlu0 %121 }
 0x11e   :  { %v123_v17 = vmul.f32 0.032258064, %v122_v16 }
 0x120   :  { %4939 = vrsqrt.f32 %v123_v17  ;;  %vm126_vm2 = vcmp.eq.f32.partialorder %v123_v17, inf  ;;  %v129_v20 = vand.u32 2147483648, %v123_v17  ;;  %vm128_vm3 = vcmp.eq.f32.partialorder %v123_v17, 0.0 }
 0x12d   :  { %v4940_v18 = vpop.eup %4939 }
 0x12e   :  { %v125_v19 = vmul.f32 %v4940_v18, %v123_v17 }
 0x130   :  { %v127_v21 = vsel %vm126_vm2, %v123_v17, %v125_v19 }
 0x131   :  { %v130_v22 = vsel %vm128_vm3, %v129_v20, %v127_v21 }
 0x132   :  { %v131_v23 = vadd.f32 1e-06, %v130_v22 }
 0x134   :  { %4941 = vrcp.f32 %v131_v23 }
 0x141   :  { %v4942_v26 = vpop.eup %4941 }
 0x142   :  { %v138_v28 = vmul.f32 %v4942_v26, %v137_v25  ;;  %v5470_v25 = vld [vmem:[%s6077_s3 + $0x4] ss:$0 sm:$0xff] }
 0x143   :  { %6126 = vst [vmem:[#allocation14_spill] sm:$0xff] %v5470_v25 }
 0x144   :  { %v5137_v29 = vadd.f32 %v5134_v27, %v138_v28 }
 0x146   :  { %4499 = vmatmul.mubr.msk.f32.vlgmr.msra.gmra.mxu0 %vm112_vm0, %v5137_v29  ;;  %4510 = vmatmul.mubr.msk.f32.vlgmr.msra.gmra.mxu1 %vm112_vm0, %v5137_v29 }
 0x147   :  { %4513 = vmatpush3.msra.mxu0 %v5142_v30  ;;  %4524 = vmatpush3.msra.mxu1 %v5147_v31 }
 0x148   :  { %4514 = vmatprep.subr.mxu0 %v6082_v7  ;;  %4525 = vmatprep.subr.mxu1 %v6082_v7 }
 0x149   :  { %4515 = vmatpush3.msra.mxu0 %v5156_v32  ;;  %4526 = vmatpush3.msra.mxu1 %v5161_v33 }
 0x14a   :  { %4516 = vmatprep.subr.mxu0 %v6082_v7  ;;  %4527 = vmatprep.subr.mxu1 %v6082_v7 }
 0x14b   :  { %4517 = vmatpush3.msra.mxu0 %v5170_v34  ;;  %4528 = vmatpush3.msra.mxu1 %v5175_v35 }
 0x14c   :  { %4518 = vmatprep.subr.mxu0 %v6082_v7  ;;  %4529 = vmatprep.subr.mxu1 %v6082_v7 }
 0x14d   :  { %4519 = vmatpush3.msra.mxu0 %v5184_v36  ;;  %4520 = vmatprep.mubr.msk.f32.mxu0 %vm5010_vm1, %v6082_v7 }
 0x14e   :  { %4530 = vmatpush3.msra.mxu1 %v5191_v37  ;;  %4531 = vmatprep.mubr.msk.f32.mxu1 %vm5010_vm1, %v6082_v7 }
 0x14f   :  { %4521 = vmatmul.mubr.msk.f32.vlgmr.msra.gmra.mxu0 %vm112_vm0, %v5137_v29  ;;  %4532 = vmatmul.mubr.msk.f32.vlgmr.msra.gmra.mxu1 %vm112_vm0, %v5137_v29 }
 0x150   :  { %4534 = vmatprep.subr.mxu0 %v6082_v7  ;;  %4545 = vmatprep.subr.mxu1 %v6082_v7 }
 0x151   :  { %4535 = vmatpush3.msra.mxu0 %v5204_v38  ;;  %4546 = vmatpush3.msra.mxu1 %v5209_v39 }
 0x152   :  { %4536 = vmatprep.subr.mxu0 %v6082_v7  ;;  %4547 = vmatprep.subr.mxu1 %v6082_v7 }
 0x153   :  { %4537 = vmatpush3.msra.mxu0 %v5220_v40  ;;  %4548 = vmatpush3.msra.mxu1 %v5225_v41 }
 0x154   :  { %4538 = vmatprep.subr.mxu0 %v6082_v7  ;;  %4549 = vmatprep.subr.mxu1 %v6082_v7 }
 0x155   :  { %4539 = vmatpush3.msra.mxu0 %v5234_v42  ;;  %4550 = vmatpush3.msra.mxu1 %v5239_v43 }
 0x156   :  { %4540 = vmatprep.subr.mxu0 %v6082_v7  ;;  %4551 = vmatprep.subr.mxu1 %v6082_v7 }
 0x157   :  { %4541 = vmatpush3.msra.mxu0 %v5248_v44  ;;  %4542 = vmatprep.mubr.msk.f32.mxu0 %vm5010_vm1, %v6082_v7 }
 0x158   :  { %4552 = vmatpush3.msra.mxu1 %v5255_v45  ;;  %4553 = vmatprep.mubr.msk.f32.mxu1 %vm5010_vm1, %v6082_v7 }
 0x159   :  { %4543 = vmatmul.mubr.msk.f32.vlgmr.msra.gmra.mxu0 %vm112_vm0, %v5137_v29  ;;  %4554 = vmatmul.mubr.msk.f32.vlgmr.msra.gmra.mxu1 %vm112_vm0, %v5137_v29 }
 0x15a   :  { %4556 = vmatprep.subr.mxu0 %v6082_v7  ;;  %4567 = vmatprep.subr.mxu1 %v6082_v7 }
 0x15b   :  { %4557 = vmatpush3.msra.mxu0 %v5268_v46  ;;  %4568 = vmatpush3.msra.mxu1 %v5273_v47 }
 0x15c   :  { %4558 = vmatprep.subr.mxu0 %v6082_v7  ;;  %4569 = vmatprep.subr.mxu1 %v6082_v7 }
 0x15d   :  { %4559 = vmatpush3.msra.mxu0 %v5284_v48  ;;  %4570 = vmatpush3.msra.mxu1 %v5289_v49 }
 0x15e   :  { %4560 = vmatprep.subr.mxu0 %v6082_v7  ;;  %4571 = vmatprep.subr.mxu1 %v6082_v7 }
 0x15f   :  { %4561 = vmatpush3.msra.mxu0 %v5298_v50  ;;  %4572 = vmatpush3.msra.mxu1 %v5303_v51 }
 0x160   :  { %4562 = vmatprep.subr.mxu0 %v6082_v7  ;;  %4573 = vmatprep.subr.mxu1 %v6082_v7 }
 0x161   :  { %4563 = vmatpush3.msra.mxu0 %v5312_v52  ;;  %4564 = vmatprep.mubr.msk.f32.mxu0 %vm5010_vm1, %v6082_v7 }
 0x162   :  { %4574 = vmatpush3.msra.mxu1 %v5319_v53  ;;  %4575 = vmatprep.mubr.msk.f32.mxu1 %vm5010_vm1, %v6082_v7 }
 0x163   :  { %4565 = vmatmul.mubr.msk.f32.vlgmr.msra.gmra.mxu0 %vm112_vm0, %v5137_v29  ;;  %4576 = vmatmul.mubr.msk.f32.vlgmr.msra.gmra.mxu1 %vm112_vm0, %v5137_v29 }
 0x164   :  { %4578 = vmatprep.subr.mxu0 %v6082_v7  ;;  %4589 = vmatprep.subr.mxu1 %v6082_v7 }
 0x165   :  { %4579 = vmatpush3.msra.mxu0 %v5332_v54  ;;  %4590 = vmatpush3.msra.mxu1 %v5337_v55 }
 0x166   :  { %4580 = vmatprep.subr.mxu0 %v6082_v7  ;;  %4591 = vmatprep.subr.mxu1 %v6082_v7 }
 0x167   :  { %4581 = vmatpush3.msra.mxu0 %v5348_v56  ;;  %4592 = vmatpush3.msra.mxu1 %v5353_v57 }
 0x168   :  { %4582 = vmatprep.subr.mxu0 %v6082_v7  ;;  %4593 = vmatprep.subr.mxu1 %v6082_v7 }
 0x169   :  { %4583 = vmatpush3.msra.mxu0 %v5362_v58  ;;  %4594 = vmatpush3.msra.mxu1 %v5367_v59 }
 0x16a   :  { %4584 = vmatprep.subr.mxu0 %v6082_v7  ;;  %4595 = vmatprep.subr.mxu1 %v6082_v7 }
 0x16b   :  { %4585 = vmatpush3.msra.mxu0 %v5376_v60  ;;  %4586 = vmatprep.mubr.msk.f32.mxu0 %vm5010_vm1, %v6082_v7 }
 0x16c   :  { %4596 = vmatpush3.msra.mxu1 %v5383_v61  ;;  %4597 = vmatprep.mubr.msk.f32.mxu1 %vm5010_vm1, %v6082_v7 }
 0x16d   :  { %4587 = vmatmul.mubr.msk.f32.vlgmr.msra.gmra.mxu0 %vm112_vm0, %v5137_v29  ;;  %4598 = vmatmul.mubr.msk.f32.vlgmr.msra.gmra.mxu1 %vm112_vm0, %v5137_v29 }
 0x16e   :  { %4600 = vmatprep.subr.mxu0 %v6082_v7  ;;  %4611 = vmatprep.subr.mxu1 %v6082_v7 }
 0x16f   :  { %4601 = vmatpush3.msra.mxu0 %v5396_v62  ;;  %4612 = vmatpush3.msra.mxu1 %v5401_v63 }
 0x170   :  { %4602 = vmatprep.subr.mxu0 %v6082_v7  ;;  %4613 = vmatprep.subr.mxu1 %v6082_v7 }
 0x171   :  { %4603 = vmatpush3.msra.mxu0 %v5412_v1  ;;  %4614 = vmatpush3.msra.mxu1 %v5417_v2 }
 0x172   :  { %4604 = vmatprep.subr.mxu0 %v6082_v7  ;;  %4615 = vmatprep.subr.mxu1 %v6082_v7 }
 0x173   :  { %4605 = vmatpush3.msra.mxu0 %v5426_v3  ;;  %4616 = vmatpush3.msra.mxu1 %v5431_v4  ;;  %v5489_v3 = vld [vmem:[%s6077_s3 + $0x1] ss:$0 sm:$0xff] }
 0x174   :  { %4606 = vmatprep.subr.mxu0 %v6082_v7  ;;  %4617 = vmatprep.subr.mxu1 %v6082_v7  ;;  %6130 = vst [vmem:[#allocation17_spill] sm:$0xff] %v5489_v3 }
 0x175   :  { %4607 = vmatpush3.msra.mxu0 %v5440_v5  ;;  %4608 = vmatprep.mubr.msk.f32.mxu0 %vm5010_vm1, %v6082_v7  ;;  %v6129_v5 = vmov 0.0  }
 0x176   :  { %4618 = vmatpush3.msra.mxu1 %v5447_v6  ;;  %4619 = vmatprep.mubr.msk.f32.mxu1 %vm5010_vm1, %v6082_v7 }
 0x177   :  { %4609 = vmatmul.mubr.msk.f32.vlgmr.msra.gmra.mxu0 %vm112_vm0, %v5137_v29  ;;  %4620 = vmatmul.mubr.msk.f32.vlgmr.msra.gmra.mxu1 %vm112_vm0, %v5137_v29  ;;  %v5475_v29 = vld [vmem:[%s6077_s3] ss:$0 sm:$0xff] }
 0x178   :  { %4622 = vmatprep.subr.mxu0 %v6082_v7  ;;  %4624 = vmatprep.mubr.msk.f32.mxu0 %vm5010_vm1, %v6082_v7  ;;  %6127 = vst [vmem:[#allocation15_spill] sm:$0xff] %v5475_v29 }
 0x179   :  { %4637 = vmatprep.subr.mxu1 %v6082_v7  ;;  %4639 = vmatprep.mubr.msk.f32.mxu1 %vm5010_vm1, %v6082_v7 }
 0x206   :  { %v285_v16 = vpop.f32.mrf.mxu0  ;;  %v355_v17 = vpop.f32.mrf.mxu1 }
 0x207   :  { %v286_v7 = vadd.f32 %v5475_v29, %v285_v16  ;;  %v5500_v16 = vld [vmem:[%s6077_s3 + $0x6] ss:$0 sm:$0xff] }
 0x208   :  { %v4500_v18 = vpop.f32.mrf.mxu0  ;;  %v4511_v19 = vpop.f32.mrf.mxu1  ;;  %6131 = vst [vmem:[#allocation18_spill] sm:$0xff] %v5500_v16 }
 0x209   :  { %v5481_v19 = vld [vmem:[%s6077_s3 + $0x5] ss:$0 sm:$0xff] }
 0x20a   :  { %6128 = vst [vmem:[#allocation16_spill] sm:$0xff] %v5481_v19 }
 0x20f   :  { %v425_v20 = vpop.f32.mrf.mxu0  ;;  %v495_v21 = vpop.f32.mrf.mxu1 }
 0x211   :  { %v4522_v22 = vpop.f32.mrf.mxu0  ;;  %v4533_v23 = vpop.f32.mrf.mxu1 }
 0x219   :  { %v565_v26 = vpop.f32.mrf.mxu0  ;;  %v635_v28 = vpop.f32.mrf.mxu1 }
 0x21a   :  { %v566_v18 = vadd.f32 %v5470_v25, %v565_v26  ;;  %v636_v26 = vadd.f32 %v5481_v19, %v635_v28 }
 0x21b   :  { %v4544_v22 = vpop.f32.mrf.mxu0  ;;  %v4555_v23 = vpop.f32.mrf.mxu1 }
 0x21c   :  { %4623 = vmatpush3.xpose.msk.msra.mxu0 %vm1059_vm4, %v566_v18  ;;  %v356_v18 = vadd.f32 %v5489_v3, %v355_v17  ;;  %v5505_v22 = vld [vmem:[%s6077_s3 + $0x7] ss:$0 sm:$0xff]  ;;  %v5512_v17 = vld [vmem:[%s6077_s3 + $0x2] ss:$0 sm:$0xff]  ;;  %v5517_v23 = vld [vmem:[%s6077_s3 + $0x3] ss:$0 sm:$0xff] }
 0x21d   :  { %4627 = vmatprep.subr.mxu0 %v6129_v5  ;;  %6132 = vst [vmem:[#allocation19_spill] sm:$0xff] %v5505_v22  ;;  %6133 = vst [vmem:[#allocation20_spill] sm:$0xff] %v5512_v17  ;;  %v496_v25 = vadd.f32 %v5517_v23, %v495_v21 }
 0x21e   :  { %6134 = vst [vmem:[#allocation21_spill] sm:$0xff] %v5517_v23 }
 0x21f   :  { %4625 = vmatmul.mubr.msk.f32.vlgmr.msra.gmra.mxu0 %vm1059_vm4, %v286_v7 }
 0x220   :  { %4628 = vmatpush3.xpose.msk.msra.mxu0 %vm1059_vm4, %v636_v26  ;;  %4629 = vmatprep.mubr.msk.f32.mxu0 %vm5010_vm1, %v6129_v5 }
 0x221   :  { %4632 = vmatprep.subr.mxu0 %v6129_v5 }
 0x223   :  { %v705_v7 = vpop.f32.mrf.mxu0  ;;  %v775_v28 = vpop.f32.mrf.mxu1  ;;  %4630 = vmatmul.mubr.msk.f32.vlgmr.msra.gmra.mxu0 %vm1059_vm4, %v356_v18  ;;  %v426_v18 = vadd.f32 %v5512_v17, %v425_v20  ;;  %v5543_v20 = vld [vmem:[%s6077_s3 + $0x9] ss:$0 sm:$0xff] }
 0x224   :  { %v706_v26 = vadd.f32 %v5500_v16, %v705_v7  ;;  %v776_v3 = vadd.f32 %v5505_v22, %v775_v28  ;;  %4634 = vmatprep.mubr.msk.f32.mxu0 %vm5010_vm1, %v6129_v5  ;;  %6136 = vst [vmem:[#allocation23_spill] sm:$0xff] %v5543_v20 }
 0x225   :  { %v4566_v19 = vpop.f32.mrf.mxu0  ;;  %v4577_v29 = vpop.f32.mrf.mxu1 }
 0x226   :  { %4633 = vmatpush3.xpose.msk.msra.mxu0 %vm1059_vm4, %v706_v26  ;;  %4638 = vmatpush3.xpose.msk.msra.mxu1 %vm1059_vm4, %v776_v3  ;;  %v5538_v3 = vld [vmem:[%s6077_s3 + $0x8] ss:$0 sm:$0xff] }
 0x227   :  { %4642 = vmatprep.subr.mxu0 %v6129_v5  ;;  %4647 = vmatprep.subr.mxu1 %v6129_v5  ;;  %6135 = vst [vmem:[#allocation22_spill] sm:$0xff] %v5538_v3 }
 0x229   :  { %4635 = vmatmul.mubr.msk.f32.vlgmr.msra.gmra.mxu0 %vm1059_vm4, %v426_v18  ;;  %4640 = vmatmul.mubr.msk.f32.vlgmr.msra.gmra.mxu1 %vm1059_vm4, %v496_v25 }
 0x22a   :  { %4644 = vmatprep.mubr.msk.f32.mxu0 %vm5010_vm1, %v6129_v5  ;;  %4649 = vmatprep.mubr.msk.f32.mxu1 %vm5010_vm1, %v6129_v5 }
 0x22d   :  { %v845_v21 = vpop.f32.mrf.mxu0  ;;  %v915_v29 = vpop.f32.mrf.mxu1 }
 0x22e   :  { %v846_v25 = vadd.f32 %v5538_v3, %v845_v21  ;;  %v916_v19 = vadd.f32 %v5543_v20, %v915_v29  ;;  %v111_v21 = vld [vmem:[%s6075_s1] sm:$0xff] }
 0x22f   :  { %v4588_v7 = vpop.f32.mrf.mxu0  ;;  %v4599_v28 = vpop.f32.mrf.mxu1  ;;  %vm1368_vm5 = vcmp.eq.f32.partialorder %v111_v21, 0.0 }
 0x230   :  { %4643 = vmatpush3.msra.mxu0 %v846_v25  ;;  %4648 = vmatpush3.msra.mxu1 %v916_v19 }
 0x231   :  { %4652 = vmatprep.subr.mxu0 %v6129_v5  ;;  %4657 = vmatprep.subr.mxu1 %v6129_v5 }
 0x237   :  { %v5549_v26 = vpop.f32.mrf.mxu0  ;;  %v5551_v18 = vpop.f32.mrf.mxu1 }
 0x239   :  { %v4610_v17 = vpop.f32.mrf.mxu0  ;;  %v4621_v23 = vpop.f32.mrf.mxu1 }
 0x2df   :  { %v1132_v3 = vpop.f32.mrf.mxu0 }
 0x2e0   :  { %v1364_v29 = vmul.f32 0.35355338, %v1132_v3 }
 0x2e1   :  { %v4626_v7 = vpop.f32.mrf.mxu0 }
 0x2e2   :  { %v1371_v25 = vsel %vm1368_vm5, -1e+09, %v1364_v29 }
 0x2e3   :  { %v1208_v19 = vpop.f32.mrf.mxu0  ;;  %v1375_v28 = vsel %vm1059_vm4, %v1371_v25, -inf }
 0x2e4   :  { %v1365_v20 = vmul.f32 0.35355338, %v1208_v19  ;;  %1376 = vmax.xlane.f32.xlu1 %v1375_v28 }
 0x2e5   :  { %v4631_v16 = vpop.f32.mrf.mxu0 }
 0x2e6   :  { %v1372_v22 = vsel %vm1368_vm5, -1e+09, %v1365_v20 }
 0x2e7   :  { %v1378_v17 = vsel %vm1059_vm4, %v1372_v22, -inf }
 0x2e8   :  { %1379 = vmax.xlane.f32.xlu1 %v1378_v17 }
 0x2e9   :  { %v1284_v23 = vpop.f32.mrf.mxu0  ;;  %v1360_v1 = vpop.f32.mrf.mxu1 }
 0x2ea   :  { %v1366_v62 = vmul.f32 0.35355338, %v1284_v23  ;;  %v1367_v60 = vmul.f32 0.35355338, %v1360_v1 }
 0x2eb   :  { %v4636_v58 = vpop.f32.mrf.mxu0  ;;  %v4641_v3 = vpop.f32.mrf.mxu1 }
 0x2ec   :  { %v1374_v7 = vsel %vm1368_vm5, -1e+09, %v1367_v60  ;;  %v1373_v29 = vsel %vm1368_vm5, -1e+09, %v1366_v62 }
 0x2ed   :  { %v1384_v56 = vsel %vm1059_vm4, %v1374_v7, -inf  ;;  %v1381_v19 = vsel %vm1059_vm4, %v1373_v29, -inf }
 0x2ee   :  { %1385 = vmax.xlane.f32.xlu1 %v1384_v56  ;;  %1382 = vmax.xlane.f32.xlu0 %v1381_v19 }
 0x36d   :  { %v1377_v16 = vpop.xlane.xlu1 %1376 }
 0x36e   :  { %v1387_v20 = vsub.f32 %v1371_v25, %v1377_v16 }
 0x370   :  { %v1391_v28 = vmul.f32 1.442695, %v1387_v20 }
 0x371   :  { %v1380_v17 = vpop.xlane.xlu1 %1379 }
 0x372   :  { %4943 = vpow2.f32 %v1391_v28  ;;  %v1388_v54 = vsub.f32 %v1372_v22, %v1380_v17 }
 0x374   :  { %v1393_v23 = vmul.f32 1.442695, %v1388_v54 }
 0x376   :  { %4945 = vpow2.f32 %v1393_v23  ;;  %v5571_v23 = vld [vmem:[%s6077_s3 + $0xa] ss:$0 sm:$0xff] }
 0x377   :  { %v1386_v58 = vpop.xlane.xlu1 %1385  ;;  %v1383_v1 = vpop.xlane.xlu0 %1382 }
 0x378   :  { %v1390_v3 = vsub.f32 %v1374_v7, %v1386_v58  ;;  %v1389_v60 = vsub.f32 %v1373_v29, %v1383_v1 }
 0x37a   :  { %v1397_v21 = vmul.f32 1.442695, %v1390_v3  ;;  %v1395_v62 = vmul.f32 1.442695, %v1389_v60  ;;  %v986_v3 = vadd.f32 %v5571_v23, %v5549_v26  ;;  %v5578_v60 = vld [vmem:[%s6077_s3 + $0xb] ss:$0 sm:$0xff] }
 0x37c   :  { %4947 = vpow2.f32 %v1397_v21 }
 0x37d   :  { %4949 = vpow2.f32 %v1395_v62 }
 0x37f   :  { %v4944_v52 = vpop.eup %4943 }
 0x380   :  { %v1399_v56 = vsel %vm1059_vm4, %v4944_v52, 0.0 }
 0x381   :  { %1400 = vadd.xlane.f32.xlu0 %v1399_v56 }
 0x383   :  { %v4946_v19 = vpop.eup %4945 }
 0x384   :  { %v1402_v25 = vsel %vm1059_vm4, %v4946_v19, 0.0 }
 0x385   :  { %1403 = vadd.xlane.f32.xlu1 %v1402_v25 }
 0x389   :  { %v4948_v16 = vpop.eup %4947 }
 0x38a   :  { %v4950_v22 = vpop.eup %4949  ;;  %v1408_v54 = vsel %vm1059_vm4, %v4948_v16, 0.0 }
 0x38b   :  { %1409 = vadd.xlane.f32.xlu1 %v1408_v54  ;;  %v1405_v7 = vsel %vm1059_vm4, %v4950_v22, 0.0 }
 0x38c   :  { %1406 = vadd.xlane.f32.xlu0 %v1405_v7 }
 0x40a   :  { %v1401_v29 = vpop.xlane.xlu0 %1400 }
 0x40b   :  { %4951 = vrcp.f32 %v1401_v29  ;;  %v5622_v29 = vld [vmem:[%s6078_s4 + $0x18] sm:$0xff] }
 0x40c   :  { %6138 = vst [vmem:[#allocation25_spill] sm:$0xff] %v5622_v29 }
 0x40e   :  { %v1404_v20 = vpop.xlane.xlu1 %1403 }
 0x40f   :  { %4953 = vrcp.f32 %v1404_v20 }
 0x414   :  { %v1410_v28 = vpop.xlane.xlu1 %1409 }
 0x415   :  { %4955 = vrcp.f32 %v1410_v28  ;;  %v1407_v17 = vpop.xlane.xlu0 %1406 }
 0x416   :  { %4957 = vrcp.f32 %v1407_v17 }
 0x418   :  { %v4952_v58 = vpop.eup %4951 }
 0x419   :  { %v1415_v1 = vmul.f32 %v4952_v58, %v4944_v52  ;;  %v1056_v52 = vadd.f32 %v5578_v60, %v5551_v18  ;;  %v5599_v18 = vld [vmem:[%s6078_s4] sm:$0xff] }
 0x41b   :  { %4645 = vmatmul.mubr.msk.f32.vlgmr.msra.gmra.mxu0 %vm1059_vm4, %v1415_v1 }
 0x41c   :  { %v4954_v21 = vpop.eup %4953  ;;  %4653 = vmatpush3.msra.mxu0 %v986_v3  ;;  %4654 = vmatprep.mubr.msk.f32.mxu0 %vm5010_vm1, %v6129_v5 }
 0x41d   :  { %v1416_v62 = vmul.f32 %v4954_v21, %v4946_v19  ;;  %4662 = vmatprep.subr.mxu0 %v6129_v5  ;;  %v5606_v19 = vld [vmem:[%s6078_s4 + $0x8] sm:$0xff] }
 0x41f   :  { %4650 = vmatmul.mubr.msk.f32.vlgmr.msra.gmra.mxu1 %vm1059_vm4, %v1416_v62 }
 0x420   :  { %4658 = vmatpush3.msra.mxu1 %v1056_v52  ;;  %4659 = vmatprep.mubr.msk.f32.mxu1 %vm5010_vm1, %v6129_v5 }
 0x421   :  { %4667 = vmatprep.subr.mxu1 %v6129_v5 }
 0x422   :  { %v4956_v26 = vpop.eup %4955 }
 0x423   :  { %v4958_v56 = vpop.eup %4957  ;;  %v1418_v25 = vmul.f32 %v4956_v26, %v4948_v16  ;;  %v5613_v16 = vld [vmem:[%s6078_s4 + $0x10] sm:$0xff] }
 0x424   :  { %v1417_v54 = vmul.f32 %v4958_v56, %v4950_v22  ;;  %6137 = vst [vmem:[#allocation24_spill] sm:$0xff] %v5613_v16 }
 0x425   :  { %4660 = vmatmul.mubr.msk.f32.vlgmr.msra.gmra.mxu1 %vm1059_vm4, %v1418_v25 }
 0x426   :  { %4655 = vmatmul.mubr.msk.f32.vlgmr.msra.gmra.mxu0 %vm1059_vm4, %v1417_v54  ;;  %4669 = vmatprep.mubr.msk.f32.mxu1 %vm5010_vm1, %v6129_v5 }
 0x427   :  { %4664 = vmatprep.mubr.msk.f32.mxu0 %vm5010_vm1, %v6129_v5  ;;  %4663 = vmatpush3.msra.mxu0 %v5599_v18 }
 0x428   :  { %4672 = vmatprep.subr.mxu0 %v6129_v5  ;;  %4668 = vmatpush3.msra.mxu1 %v5606_v19 }
 0x429   :  { %4677 = vmatprep.subr.mxu1 %v6129_v5 }
 0x4db   :  { %v1488_v22 = vpop.f32.mrf.mxu0 }
 0x4dc   :  { %4665 = vmatmul.mubr.msk.f32.vlgmr.msra.gmra.mxu0 %vm1059_vm4, %v1488_v22 }
 0x4dd   :  { %v4646_v7 = vpop.f32.mrf.mxu0  ;;  %4673 = vmatpush3.msra.mxu0 %v5613_v16  ;;  %4674 = vmatprep.mubr.msk.f32.mxu0 %vm5010_vm1, %v6129_v5 }
 0x4de   :  { %4682 = vmatprep.subr.mxu0 %v6129_v5 }
 0x4df   :  { %v1561_v20 = vpop.f32.mrf.mxu1 }
 0x4e0   :  { %4670 = vmatmul.mubr.msk.f32.vlgmr.msra.gmra.mxu1 %vm1059_vm4, %v1561_v20 }
 0x4e1   :  { %v4651_v28 = vpop.f32.mrf.mxu1  ;;  %4678 = vmatpush3.msra.mxu1 %v5622_v29  ;;  %4679 = vmatprep.mubr.msk.f32.mxu1 %vm5010_vm1, %v6129_v5 }
 0x4e2   :  { %4693 = vmatprep.subr.mxu1 %v6129_v5 }
 0x4e5   :  { %v1707_v17 = vpop.f32.mrf.mxu1 }
 0x4e6   :  { %v1634_v58 = vpop.f32.mrf.mxu0  ;;  %4680 = vmatmul.mubr.msk.f32.vlgmr.msra.gmra.mxu1 %vm1059_vm4, %v1707_v17 }
 0x4e7   :  { %4675 = vmatmul.mubr.msk.f32.vlgmr.msra.gmra.mxu0 %vm1059_vm4, %v1634_v58  ;;  %v4661_v1 = vpop.f32.mrf.mxu1  ;;  %4709 = vmatprep.mubr.msk.f32.mxu1 %vm5010_vm1, %v6129_v5 }
 0x4e8   :  { %v4656_v3 = vpop.f32.mrf.mxu0  ;;  %4690 = vmatprep.mubr.msk.f32.mxu0 %vm5010_vm1, %v6129_v5  ;;  %v5642_v1 = vld [vmem:[%s6080_s6 + $0x4] ss:$0 sm:$0xff] }
 0x4e9   :  { %6139 = vst [vmem:[#allocation26_spill] sm:$0xff] %v5642_v1 }
 0x59c   :  { %v1780_v21 = vpop.f32.mrf.mxu0 }
 0x59d   :  { %v2003_v25 = vsel %vm112_vm0, %v1780_v21, 0.0 }
 0x59e   :  { %v4666_v62 = vpop.f32.mrf.mxu0 }
 0x5a0   :  { %v1853_v52 = vpop.f32.mrf.mxu1 }
 0x5a1   :  { %v2004_v56 = vsel %vm112_vm0, %v1853_v52, 0.0 }
 0x5a2   :  { %v4671_v26 = vpop.f32.mrf.mxu1  ;;  %v2005_v22 = vadd.f32 %v2004_v56, %v2003_v25 }
 0x5a3   :  { %v5652_v26 = vld [vmem:[%s6074_s0 + $0x8] sm:$0xff] }
 0x5a4   :  { %6140 = vst [vmem:[#allocation27_spill] sm:$0xff] %v5652_v26  ;;  %v2208_v25 = vsel %vm112_vm0, %v5652_v26, 0.0 }
 0x5a6   :  { %v1999_v54 = vpop.f32.mrf.mxu1 }
 0x5a7   :  { %v1926_v7 = vpop.f32.mrf.mxu0  ;;  %v2008_v3 = vsel %vm112_vm0, %v1999_v54, 0.0 }
 0x5a8   :  { %v2006_v20 = vsel %vm112_vm0, %v1926_v7, 0.0  ;;  %v4681_v28 = vpop.f32.mrf.mxu1 }
 0x5a9   :  { %v2007_v17 = vadd.f32 %v2006_v20, %v2005_v22  ;;  %v4676_v58 = vpop.f32.mrf.mxu0 }
 0x5ab   :  { %v2009_v62 = vadd.f32 %v2008_v3, %v2007_v17 }
 0x5ad   :  { %v2014_v52 = vadd.f32 %v5642_v1, %v2009_v62 }
 0x5af   :  { %v5647_v21 = vadd.f32 %v2014_v52, %v5057_v0  ;;  %v5673_v52 = vld [vmem:[%s6079_s5 + $0x18] sm:$0xff] }
 0x5b0   :  { %6141 = vst [vmem:[#allocation28_spill] sm:$0xff] %v5673_v52  ;;  %4683 = vmatpush3.msra.mxu0 %v5673_v52 }
 0x5b1   :  { %v2016_v56 = vsel %vm112_vm0, %v5647_v21, 0.0  ;;  %4684 = vmatprep.subr.mxu0 %v6129_v5 }
 0x5b2   :  { %2017 = vadd.xlane.f32.xlu0 %v2016_v56  ;;  %v5680_v56 = vld [vmem:[%s6079_s5 + $0x10] sm:$0xff] }
 0x5b3   :  { %6142 = vst [vmem:[#allocation29_spill] sm:$0xff] %v5680_v56  ;;  %4685 = vmatpush3.msra.mxu0 %v5680_v56 }
 0x5b4   :  { %4686 = vmatprep.subr.mxu0 %v6129_v5 }
 0x5b6   :  { %2209 = vadd.xlane.f32.xlu0 %v2208_v25  ;;  %v5687_v25 = vld [vmem:[%s6079_s5 + $0x8] sm:$0xff] }
 0x5b7   :  { %6143 = vst [vmem:[#allocation30_spill] sm:$0xff] %v5687_v25  ;;  %4687 = vmatpush3.msra.mxu0 %v5687_v25 }
 0x5b8   :  { %4688 = vmatprep.subr.mxu0 %v6129_v5 }
 0x63b   :  { %v2018_v54 = vpop.xlane.xlu0 %2017 }
 0x63c   :  { %v2019_v22 = vmul.f32 0.03125, %v2018_v54  ;;  %v5694_v54 = vld [vmem:[%s6079_s5] sm:$0xff] }
 0x63d   :  { %6144 = vst [vmem:[#allocation31_spill] sm:$0xff] %v5694_v54  ;;  %4689 = vmatpush3.msra.mxu0 %v5694_v54 }
 0x63e   :  { %v5659_v7 = vsub.f32 %v5647_v21, %v2019_v22  ;;  %4712 = vmatprep.subr.mxu0 %v6129_v5  ;;  %v5701_v22 = vld [vmem:[%s6079_s5 + $0x58] sm:$0xff] }
 0x63f   :  { %v2210_v0 = vpop.xlane.xlu0 %2209  ;;  %6145 = vst [vmem:[#allocation32_spill] sm:$0xff] %v5701_v22  ;;  %4694 = vmatpush3.msra.mxu1 %v5701_v22 }
 0x640   :  { %v2021_v20 = vmul.f32 %v5659_v7, %v5659_v7  ;;  %v2211_v28 = vmul.f32 0.03125, %v2210_v0  ;;  %v5706_v0 = vld [vmem:[%s6079_s5 + $0x50] sm:$0xff]  ;;  %4695 = vmatprep.subr.mxu1 %v6129_v5 }
 0x641   :  { %6146 = vst [vmem:[#allocation33_spill] sm:$0xff] %v5706_v0  ;;  %4696 = vmatpush3.msra.mxu1 %v5706_v0 }
 0x642   :  { %v2022_v17 = vsel %vm112_vm0, %v2021_v20, 0.0  ;;  %v5665_v58 = vsub.f32 %v5652_v26, %v2211_v28  ;;  %v5713_v20 = vld [vmem:[%s6079_s5 + $0x48] sm:$0xff]  ;;  %4697 = vmatprep.subr.mxu1 %v6129_v5  ;;  %v5720_v28 = vld [vmem:[%s6079_s5 + $0x40] sm:$0xff] }
 0x643   :  { %2023 = vadd.xlane.f32.xlu1 %v2022_v17  ;;  %6147 = vst [vmem:[#allocation34_spill] sm:$0xff] %v5713_v20  ;;  %6148 = vst [vmem:[#allocation35_spill] sm:$0xff] %v5720_v28  ;;  %4698 = vmatpush3.msra.mxu1 %v5713_v20  ;;  %v5727_v17 = vld [vmem:[%s6079_s5 + $0x38] sm:$0xff] }
 0x644   :  { %v2213_v3 = vmul.f32 %v5665_v58, %v5665_v58  ;;  %4699 = vmatprep.subr.mxu1 %v6129_v5  ;;  %6149 = vst [vmem:[#allocation36_spill] sm:$0xff] %v5727_v17 }
 0x645   :  { %4700 = vmatpush3.msra.mxu1 %v5720_v28 }
 0x646   :  { %v2214_v62 = vsel %vm112_vm0, %v2213_v3, 0.0  ;;  %4701 = vmatprep.subr.mxu1 %v6129_v5  ;;  %v5734_v3 = vld [vmem:[%s6079_s5 + $0x30] sm:$0xff] }
 0x647   :  { %2215 = vadd.xlane.f32.xlu1 %v2214_v62  ;;  %6150 = vst [vmem:[#allocation37_spill] sm:$0xff] %v5734_v3  ;;  %4702 = vmatpush3.msra.mxu1 %v5727_v17 }
 0x648   :  { %4703 = vmatprep.subr.mxu1 %v6129_v5 }
 0x649   :  { %4704 = vmatpush3.msra.mxu1 %v5734_v3 }
 0x64a   :  { %4705 = vmatprep.subr.mxu1 %v6129_v5 }
 0x6cc   :  { %v2024_v62 = vpop.xlane.xlu1 %2023 }
 0x6cd   :  { %v2025_v26 = vmul.f32 0.032258064, %v2024_v62 }
 0x6cf   :  { %4959 = vrsqrt.f32 %v2025_v26  ;;  %vm2028_vm6 = vcmp.eq.f32.partialorder %v2025_v26, inf  ;;  %v2031_v25 = vand.u32 2147483648, %v2025_v26  ;;  %vm2030_vm7 = vcmp.eq.f32.partialorder %v2025_v26, 0.0 }
 0x6d0   :  { %v2216_v1 = vpop.xlane.xlu1 %2215 }
 0x6d1   :  { %v2217_v28 = vmul.f32 0.032258064, %v2216_v1  ;;  %v5743_v1 = vld [vmem:[%s6080_s6 + $0x2] ss:$0 sm:$0xff] }
 0x6d3   :  { %4961 = vrsqrt.f32 %v2217_v28  ;;  %vm2220_vm8 = vcmp.eq.f32.partialorder %v2217_v28, inf  ;;  %v2223_v52 = vand.u32 2147483648, %v2217_v28  ;;  %vm2222_vm9 = vcmp.eq.f32.partialorder %v2217_v28, 0.0 }
 0x6dc   :  { %v4960_v54 = vpop.eup %4959 }
 0x6dd   :  { %v2027_v20 = vmul.f32 %v4960_v54, %v2025_v26 }
 0x6df   :  { %v2029_v0 = vsel %vm2028_vm6, %v2025_v26, %v2027_v20  ;;  %v2039_v26 = vmul.f32 %v5743_v1, %v5659_v7  ;;  %v6162_v20 = vld [vmem:[#allocation16_spill] sm:$0xff] }
 0x6e0   :  { %v4962_v56 = vpop.eup %4961  ;;  %v2032_v17 = vsel %vm2030_vm7, %v2031_v25, %v2029_v0  ;;  %v5750_v25 = vld [vmem:[%s6080_s6 + $0x3] ss:$0 sm:$0xff] }
 0x6e1   :  { %v2033_v22 = vadd.f32 1e-06, %v2032_v17  ;;  %v2219_v3 = vmul.f32 %v4962_v56, %v2217_v28  ;;  %v2227_v56 = vmul.f32 %v5128_v24, %v5665_v58  ;;  %v6161_v58 = vld [vmem:[#allocation15_spill] sm:$0xff] }
 0x6e3   :  { %4963 = vrcp.f32 %v2033_v22  ;;  %v2221_v29 = vsel %vm2220_vm8, %v2217_v28, %v2219_v3 }
 0x6e4   :  { %v2224_v62 = vsel %vm2222_vm9, %v2223_v52, %v2221_v29 }
 0x6e5   :  { %v2225_v16 = vadd.f32 1e-06, %v2224_v62  ;;  %v6164_v62 = vld [vmem:[#allocation19_spill] sm:$0xff] }
 0x6e7   :  { %4965 = vrcp.f32 %v2225_v16 }
 0x6f0   :  { %v4964_v54 = vpop.eup %4963 }
 0x6f1   :  { %v2040_v29 = vmul.f32 %v4964_v54, %v2039_v26  ;;  %v6165_v54 = vld [vmem:[#allocation18_spill] sm:$0xff] }
 0x6f3   :  { %v2045_v16 = vadd.f32 %v5750_v25, %v2040_v29 }
 0x6f4   :  { %v4966_v52 = vpop.eup %4965 }
 0x6f5   :  { %v2228_v22 = vmul.f32 %v4966_v52, %v2227_v56  ;;  %4691 = vmatmul.mubr.msk.f32.vlgmr.msra.gmra.mxu0 %vm112_vm0, %v2045_v16  ;;  %v6166_v16 = vld [vmem:[#allocation21_spill] sm:$0xff] }
 0x6f6   :  { %4713 = vmatpush3.msra.mxu0 %v5068_v8  ;;  %4720 = vmatprep.mubr.msk.f32.mxu0 %vm5010_vm1, %v6129_v5  ;;  %v5848_v8 = vld [vmem:[%s6079_s5 + $0x28] sm:$0xff] }
 0x6f7   :  { %4714 = vmatprep.subr.mxu0 %v6129_v5  ;;  %v5762_v7 = vadd.f32 %v5134_v27, %v2228_v22  ;;  %4706 = vmatpush3.msra.mxu1 %v5848_v8  ;;  %v6167_v22 = vld [vmem:[#allocation20_spill] sm:$0xff] }
 0x6f8   :  { %4715 = vmatpush3.msra.mxu0 %v5082_v10  ;;  %4707 = vmatprep.subr.mxu1 %v6129_v5  ;;  %v5862_v10 = vld [vmem:[%s6080_s6 + $0x6] ss:$0 sm:$0xff] }
 0x6f9   :  { %4716 = vmatprep.subr.mxu0 %v6129_v5 }
 0x6fa   :  { %4717 = vmatpush3.msra.mxu0 %v5096_v12 }
 0x6fb   :  { %4718 = vmatprep.subr.mxu0 %v6129_v5 }
 0x6fc   :  { %4719 = vmatpush3.msra.mxu0 %v5110_v14 }
 0x6fd   :  { %4723 = vmatprep.subr.mxu0 %v6129_v5  ;;  %4721 = vmatmul.mubr.msk.f32.vlgmr.msra.gmra.mxu0 %vm112_vm0, %v5762_v7 }
 0x6fe   :  { %4724 = vmatpush3.msra.mxu0 %v5073_v9  ;;  %4731 = vmatprep.mubr.msk.f32.mxu0 %vm5010_vm1, %v6129_v5  ;;  %v5853_v9 = vld [vmem:[%s6079_s5 + $0x20] sm:$0xff] }
 0x6ff   :  { %4725 = vmatprep.subr.mxu0 %v6129_v5  ;;  %4708 = vmatpush3.msra.mxu1 %v5853_v9 }
 0x700   :  { %4726 = vmatpush3.msra.mxu0 %v5087_v11  ;;  %4734 = vmatprep.subr.mxu1 %v6129_v5 }
 0x701   :  { %4727 = vmatprep.subr.mxu0 %v6129_v5 }
 0x702   :  { %4728 = vmatpush3.msra.mxu0 %v5101_v13 }
 0x703   :  { %4729 = vmatprep.subr.mxu0 %v6129_v5 }
 0x704   :  { %4730 = vmatpush3.msra.mxu0 %v5115_v15 }
 0x705   :  { %4732 = vmatmul.mubr.msk.f32.vlgmr.msra.gmra.mxu0 %vm112_vm0, %v5762_v7  ;;  %4745 = vmatprep.subr.mxu0 %v6129_v5 }
 0x706   :  { %4746 = vmatpush3.msra.mxu0 %v5147_v31  ;;  %4753 = vmatprep.mubr.msk.f32.mxu0 %vm5010_vm1, %v6129_v5 }
 0x707   :  { %4747 = vmatprep.subr.mxu0 %v6129_v5 }
 0x708   :  { %4748 = vmatpush3.msra.mxu0 %v5161_v33  ;;  %v6151_v33 = vld [vmem:[#allocation5_spill] sm:$0xff] }
 0x709   :  { %4749 = vmatprep.subr.mxu0 %v6129_v5 }
 0x70a   :  { %4750 = vmatpush3.msra.mxu0 %v5175_v35 }
 0x70b   :  { %4751 = vmatprep.subr.mxu0 %v6129_v5 }
 0x70c   :  { %4752 = vmatpush3.msra.mxu0 %v5191_v37 }
 0x70d   :  { %4754 = vmatmul.mubr.msk.f32.vlgmr.msra.gmra.mxu0 %vm112_vm0, %v5762_v7  ;;  %4767 = vmatprep.subr.mxu0 %v6129_v5 }
 0x70e   :  { %4768 = vmatpush3.msra.mxu0 %v5209_v39  ;;  %4775 = vmatprep.mubr.msk.f32.mxu0 %vm5010_vm1, %v6129_v5  ;;  %v6155_v39 = vld [vmem:[#allocation9_spill] sm:$0xff] }
 0x70f   :  { %4769 = vmatprep.subr.mxu0 %v6129_v5 }
 0x710   :  { %4770 = vmatpush3.msra.mxu0 %v5225_v41 }
 0x711   :  { %4771 = vmatprep.subr.mxu0 %v6129_v5 }
 0x712   :  { %4772 = vmatpush3.msra.mxu0 %v5239_v43 }
 0x713   :  { %4773 = vmatprep.subr.mxu0 %v6129_v5 }
 0x714   :  { %4774 = vmatpush3.msra.mxu0 %v5255_v45  ;;  %v6159_v45 = vld [vmem:[#allocation13_spill] sm:$0xff] }
 0x715   :  { %4776 = vmatmul.mubr.msk.f32.vlgmr.msra.gmra.mxu0 %vm112_vm0, %v5762_v7  ;;  %4789 = vmatprep.subr.mxu0 %v6129_v5 }
 0x716   :  { %4790 = vmatpush3.msra.mxu0 %v5273_v47  ;;  %4797 = vmatprep.mubr.msk.f32.mxu0 %vm5010_vm1, %v6129_v5 }
 0x717   :  { %4791 = vmatprep.subr.mxu0 %v6129_v5 }
 0x718   :  { %4792 = vmatpush3.msra.mxu0 %v5289_v49 }
 0x719   :  { %4793 = vmatprep.subr.mxu0 %v6129_v5 }
 0x71a   :  { %4794 = vmatpush3.msra.mxu0 %v5303_v51 }
 0x71b   :  { %4795 = vmatprep.subr.mxu0 %v6129_v5 }
 0x71c   :  { %4796 = vmatpush3.msra.mxu0 %v5319_v53 }
 0x71d   :  { %4798 = vmatmul.mubr.msk.f32.vlgmr.msra.gmra.mxu0 %vm112_vm0, %v5762_v7  ;;  %4811 = vmatprep.subr.mxu0 %v6129_v5 }
 0x71e   :  { %4812 = vmatpush3.msra.mxu0 %v5337_v55  ;;  %4819 = vmatprep.mubr.msk.f32.mxu0 %vm5010_vm1, %v6129_v5 }
 0x71f   :  { %4813 = vmatprep.subr.mxu0 %v6129_v5 }
 0x720   :  { %4814 = vmatpush3.msra.mxu0 %v5353_v57 }
 0x721   :  { %4815 = vmatprep.subr.mxu0 %v6129_v5 }
 0x722   :  { %4816 = vmatpush3.msra.mxu0 %v5367_v59 }
 0x723   :  { %4817 = vmatprep.subr.mxu0 %v6129_v5 }
 0x724   :  { %4818 = vmatpush3.msra.mxu0 %v5383_v61 }
 0x725   :  { %4820 = vmatmul.mubr.msk.f32.vlgmr.msra.gmra.mxu0 %vm112_vm0, %v5762_v7  ;;  %4833 = vmatprep.subr.mxu0 %v6129_v5 }
 0x726   :  { %4834 = vmatpush3.msra.mxu0 %v5401_v63  ;;  %4841 = vmatprep.mubr.msk.f32.mxu0 %vm5010_vm1, %v6129_v5 }
 0x727   :  { %4835 = vmatprep.subr.mxu0 %v6129_v5 }
 0x728   :  { %4836 = vmatpush3.msra.mxu0 %v5417_v2  ;;  %v6160_v2 = vld [vmem:[#allocation14_spill] sm:$0xff] }
 0x729   :  { %4837 = vmatprep.subr.mxu0 %v6129_v5 }
 0x72a   :  { %4838 = vmatpush3.msra.mxu0 %v5431_v4 }
 0x72b   :  { %4839 = vmatprep.subr.mxu0 %v6129_v5 }
 0x72c   :  { %4840 = vmatpush3.msra.mxu0 %v5447_v6 }
 0x72d   :  { %4842 = vmatmul.mubr.msk.f32.vlgmr.msra.gmra.mxu0 %vm112_vm0, %v5762_v7  ;;  %4854 = vmatprep.subr.mxu0 %v6129_v5 }
 0x72e   :  { %4856 = vmatprep.mubr.msk.f32.mxu0 %vm5010_vm1, %v6129_v5 }
 0x7b5   :  { %v2119_v11 = vpop.f32.mrf.mxu0 }
 0x7b6   :  { %v2120_v12 = vadd.f32 %v5862_v10, %v2119_v11  ;;  %v6168_v11 = vld [vmem:[#allocation23_spill] sm:$0xff] }
 0x7b7   :  { %v4692_v13 = vpop.f32.mrf.mxu0 }
 0x7b8   :  { %v2123_v14 = vmax.f32 %v2120_v12, 0.0 }
 0x7ba   :  { %4710 = vmatmul.mubr.msk.f32.vlgmr.msra.gmra.mxu1 %vm2128_vm10, %v2123_v14  ;;  %v6169_v14 = vld [vmem:[#allocation22_spill] sm:$0xff] }
 0x7bb   :  { %4735 = vmatpush3.msra.mxu1 %v5142_v30  ;;  %4742 = vmatprep.mubr.msk.f32.mxu1 %vm5010_vm1, %v6129_v5 }
 0x7bc   :  { %4736 = vmatprep.subr.mxu1 %v6129_v5 }
 0x7bd   :  { %4737 = vmatpush3.msra.mxu1 %v5156_v32  ;;  %v5871_v15 = vpop.f32.mrf.mxu0 }
 0x7be   :  { %4738 = vmatprep.subr.mxu1 %v6129_v5  ;;  %v2300_v0 = vadd.f32 %v6161_v58, %v5871_v15 }
 0x7bf   :  { %4739 = vmatpush3.msra.mxu1 %v5170_v34  ;;  %v4722_v24 = vpop.f32.mrf.mxu0  ;;  %v6152_v34 = vld [vmem:[#allocation6_spill] sm:$0xff] }
 0x7c0   :  { %4740 = vmatprep.subr.mxu1 %v6129_v5 }
 0x7c1   :  { %4741 = vmatpush3.msra.mxu1 %v5184_v36  ;;  %v6153_v36 = vld [vmem:[#allocation7_spill] sm:$0xff] }
 0x7c2   :  { %4743 = vmatmul.mubr.msk.f32.vlgmr.msra.gmra.mxu1 %vm112_vm0, %v5762_v7  ;;  %4756 = vmatprep.subr.mxu1 %v6129_v5 }
 0x7c3   :  { %4757 = vmatpush3.msra.mxu1 %v5204_v38  ;;  %4764 = vmatprep.mubr.msk.f32.mxu1 %vm5010_vm1, %v6129_v5  ;;  %v6154_v38 = vld [vmem:[#allocation8_spill] sm:$0xff] }
 0x7c4   :  { %4758 = vmatprep.subr.mxu1 %v6129_v5 }
 0x7c5   :  { %v5884_v27 = vpop.f32.mrf.mxu0  ;;  %4759 = vmatpush3.msra.mxu1 %v5220_v40  ;;  %v6156_v40 = vld [vmem:[#allocation10_spill] sm:$0xff] }
 0x7c6   :  { %4760 = vmatprep.subr.mxu1 %v6129_v5 }
 0x7c7   :  { %v4733_v30 = vpop.f32.mrf.mxu0  ;;  %4761 = vmatpush3.msra.mxu1 %v5234_v42  ;;  %v6157_v42 = vld [vmem:[#allocation11_spill] sm:$0xff] }
 0x7c8   :  { %4762 = vmatprep.subr.mxu1 %v6129_v5 }
 0x7c9   :  { %4763 = vmatpush3.msra.mxu1 %v5248_v44  ;;  %v6158_v44 = vld [vmem:[#allocation12_spill] sm:$0xff] }
 0x7ca   :  { %4765 = vmatmul.mubr.msk.f32.vlgmr.msra.gmra.mxu1 %vm112_vm0, %v5762_v7  ;;  %4778 = vmatprep.subr.mxu1 %v6129_v5 }
 0x7cb   :  { %4779 = vmatpush3.msra.mxu1 %v5268_v46  ;;  %4786 = vmatprep.mubr.msk.f32.mxu1 %vm5010_vm1, %v6129_v5 }
 0x7cc   :  { %4780 = vmatprep.subr.mxu1 %v6129_v5 }
 0x7cd   :  { %v5898_v31 = vpop.f32.mrf.mxu0  ;;  %4781 = vmatpush3.msra.mxu1 %v5284_v48 }
 0x7ce   :  { %4782 = vmatprep.subr.mxu1 %v6129_v5  ;;  %v2510_v52 = vadd.f32 %v6166_v16, %v5898_v31  ;;  %v4263_v31 = vld [vmem:[%s6075_s1 + $0x8] sm:$0xff]  ;;  %s5011_s1 = smov [#allocation2]  }
 0x7cf   :  { %v4755_v32 = vpop.f32.mrf.mxu0  ;;  %4783 = vmatpush3.msra.mxu1 %v5298_v50  ;;  %v5939_v50 = vld [vmem:[%s6080_s6 + $0x5] ss:$0 sm:$0xff]  ;;  %vm3381_vm11 = vcmp.eq.f32.partialorder %v4263_v31, 0.0  ;;  %s4202_s26 = sshll.u32 %s5011_s1, 4  ;;  %s4203_s26 = int_to_ptr.vmem [resolvable:$true] %s4202_s26 }
 0x7d0   :  { %4784 = vmatprep.subr.mxu1 %v6129_v5  ;;  %s4987_s27 = scalar_lea.vmem %s4203_s26, 256  ;;  %p4992_p1 = scmp.lt.s32.totalorder %s4203_s26, %s4203_s26 }
 0x7d1   :  { %4785 = vmatpush3.msra.mxu1 %v6151_v33  ;;  %p4988_p0 = scmp.ne.s32.totalorder %s4203_s26, %s4987_s27  ;;  %p4993_p2 = scmp.lt.s32.totalorder %s4987_s27, %s4987_s27 }
 0x7d2   :  { %4787 = vmatmul.mubr.msk.f32.vlgmr.msra.gmra.mxu1 %vm112_vm0, %v5762_v7  ;;  %4800 = vmatprep.subr.mxu1 %v6129_v5 }
 0x7d3   :  { %4801 = vmatpush3.msra.mxu1 %v6152_v34  ;;  %4808 = vmatprep.mubr.msk.f32.mxu1 %vm5010_vm1, %v6129_v5  ;;  %p4994_p3 = por %p4993_p2, %p4992_p1 }
 0x7d4   :  { %4802 = vmatprep.subr.mxu1 %v6129_v5 }
 0x7d5   :  { %v2649_v35 = vpop.f32.mrf.mxu0  ;;  %4803 = vmatpush3.msra.mxu1 %v6153_v36  ;;  %p4995_p4 = pnand %p4994_p3, %p4988_p0 }
 0x7d6   :  { %4804 = vmatprep.subr.mxu1 %v6129_v5  ;;  %v2650_v28 = vadd.f32 %v6162_v20, %v2649_v35 }
 0x7d7   :  { %v4777_v37 = vpop.f32.mrf.mxu0  ;;  %4805 = vmatpush3.msra.mxu1 %v6154_v38 }
 0x7d8   :  { %4806 = vmatprep.subr.mxu1 %v6129_v5 }
 0x7d9   :  { %4807 = vmatpush3.msra.mxu1 %v6155_v39 }
 0x7da   :  { %4809 = vmatmul.mubr.msk.f32.vlgmr.msra.gmra.mxu1 %vm112_vm0, %v5762_v7  ;;  %4822 = vmatprep.subr.mxu1 %v6129_v5 }
 0x7db   :  { %4823 = vmatpush3.msra.mxu1 %v6156_v40  ;;  %4830 = vmatprep.mubr.msk.f32.mxu1 %vm5010_vm1, %v6129_v5 }
 0x7dc   :  { %4824 = vmatprep.subr.mxu1 %v6129_v5 }
 0x7dd   :  { %v2789_v41 = vpop.f32.mrf.mxu0  ;;  %4825 = vmatpush3.msra.mxu1 %v6157_v42 }
 0x7de   :  { %4826 = vmatprep.subr.mxu1 %v6129_v5  ;;  %v2790_v26 = vadd.f32 %v6164_v62, %v2789_v41 }
 0x7df   :  { %v4799_v43 = vpop.f32.mrf.mxu0  ;;  %4827 = vmatpush3.msra.mxu1 %v6158_v44 }
 0x7e0   :  { %4828 = vmatprep.subr.mxu1 %v6129_v5 }
 0x7e1   :  { %4829 = vmatpush3.msra.mxu1 %v6159_v45 }
 0x7e2   :  { %4831 = vmatmul.mubr.msk.f32.vlgmr.msra.gmra.mxu1 %vm112_vm0, %v5762_v7  ;;  %4844 = vmatprep.subr.mxu1 %v6129_v5 }
 0x7e3   :  { %4846 = vmatprep.mubr.msk.f32.mxu1 %vm5010_vm1, %v6129_v5 }
 0x7e5   :  { %v2929_v46 = vpop.f32.mrf.mxu0 }
 0x7e6   :  { %v2930_v12 = vadd.f32 %v6168_v11, %v2929_v46 }
 0x7e7   :  { %v4821_v47 = vpop.f32.mrf.mxu0 }
 0x7ed   :  { %v5934_v48 = vpop.f32.mrf.mxu0 }
 0x7ef   :  { %v4843_v49 = vpop.f32.mrf.mxu0 }
 0x87a   :  { %v2198_v51 = vpop.f32.mrf.mxu1 }
 0x87b   :  { %v2199_v53 = vadd.f32 %v5939_v50, %v2198_v51 }
 0x87c   :  { %v4711_v55 = vpop.f32.mrf.mxu1 }
 0x87d   :  { %v2202_v57 = vadd.f32 %v2199_v53, %v5647_v21  ;;  %v6163_v21 = vld [vmem:[#allocation17_spill] sm:$0xff] }
 0x87e   :  { %v2370_v17 = vadd.f32 %v6163_v21, %v5884_v27 }
 0x87f   :  { %2203 = vst.msk [vmem:[#allocation2] sm:$0xff] %vm112_vm0, %v2202_v57 }
 0x882   :  { %v2439_v59 = vpop.f32.mrf.mxu1 }
 0x883   :  { %v2440_v7 = vadd.f32 %v6167_v22, %v2439_v59 }
 0x884   :  { %v4744_v61 = vpop.f32.mrf.mxu1 }
 0x88a   :  { %v2579_v63 = vpop.f32.mrf.mxu1 }
 0x88b   :  { %v2580_v4 = vadd.f32 %v6160_v2, %v2579_v63 }
 0x88c   :  { %v4766_v6 = vpop.f32.mrf.mxu1 }
 0x88d   :  { %4845 = vmatpush3.xpose.msk.msra.mxu1 %vm1059_vm4, %v2580_v4 }
 0x88e   :  { %4849 = vmatprep.subr.mxu1 %v6129_v5 }
 0x890   :  { %4847 = vmatmul.mubr.msk.f32.vlgmr.msra.gmra.mxu1 %vm1059_vm4, %v2300_v0 }
 0x891   :  { %4850 = vmatpush3.xpose.msk.msra.mxu1 %vm1059_vm4, %v2650_v28  ;;  %4851 = vmatprep.mubr.msk.f32.mxu1 %vm5010_vm1, %v6129_v5 }
 0x892   :  { %v2719_v3 = vpop.f32.mrf.mxu1  ;;  %4859 = vmatprep.subr.mxu1 %v6129_v5 }
 0x893   :  { %v2720_v56 = vadd.f32 %v6165_v54, %v2719_v3 }
 0x894   :  { %v4788_v29 = vpop.f32.mrf.mxu1  ;;  %4852 = vmatmul.mubr.msk.f32.vlgmr.msra.gmra.mxu1 %vm1059_vm4, %v2370_v17 }
 0x895   :  { %4855 = vmatpush3.xpose.msk.msra.mxu0 %vm1059_vm4, %v2720_v56  ;;  %4860 = vmatpush3.xpose.msk.msra.mxu1 %vm1059_vm4, %v2790_v26 }
 0x896   :  { %4861 = vmatprep.mubr.msk.f32.mxu1 %vm5010_vm1, %v6129_v5  ;;  %4869 = vmatprep.subr.mxu1 %v6129_v5 }
 0x897   :  { %4864 = vmatprep.subr.mxu0 %v6129_v5 }
 0x898   :  { %4857 = vmatmul.mubr.msk.f32.vlgmr.msra.gmra.mxu0 %vm1059_vm4, %v2440_v7  ;;  %4862 = vmatmul.mubr.msk.f32.vlgmr.msra.gmra.mxu1 %vm1059_vm4, %v2510_v52 }
 0x899   :  { %4870 = vmatpush3.msra.mxu1 %v2930_v12  ;;  %4866 = vmatprep.mubr.msk.f32.mxu0 %vm5010_vm1, %v6129_v5 }
 0x89a   :  { %v2859_v13 = vpop.f32.mrf.mxu1  ;;  %4871 = vmatprep.mubr.msk.f32.mxu1 %vm5010_vm1, %v6129_v5  ;;  %4879 = vmatprep.subr.mxu1 %v6129_v5 }
 0x89b   :  { %v2860_v15 = vadd.f32 %v6169_v14, %v2859_v13 }
 0x89c   :  { %v4810_v24 = vpop.f32.mrf.mxu1 }
 0x89d   :  { %4865 = vmatpush3.msra.mxu0 %v2860_v15 }
 0x89e   :  { %4874 = vmatprep.subr.mxu0 %v6129_v5 }
 0x8a2   :  { %v5979_v27 = vpop.f32.mrf.mxu1 }
 0x8a3   :  { %v3000_v14 = vadd.f32 %v5571_v23, %v5979_v27 }
 0x8a4   :  { %v4832_v30 = vpop.f32.mrf.mxu1 }
 0x8a5   :  { %v3070_v30 = vadd.f32 %v5578_v60, %v5934_v48 }
 0x950   :  { %v3145_v32 = vpop.f32.mrf.mxu1 }
 0x951   :  { %v3377_v33 = vmul.f32 0.35355338, %v3145_v32 }
 0x952   :  { %v4848_v34 = vpop.f32.mrf.mxu1 }
 0x953   :  { %v3384_v35 = vsel %vm3381_vm11, -1e+09, %v3377_v33  ;;  %v6170_v33 = vld [vmem:[#allocation24_spill] sm:$0xff]  ;;  %v6171_v34 = vld [vmem:[#allocation25_spill] sm:$0xff] }
 0x954   :  { %v3221_v36 = vpop.f32.mrf.mxu1  ;;  %v3388_v37 = vsel %vm1059_vm4, %v3384_v35, -inf }
 0x955   :  { %v3378_v38 = vmul.f32 0.35355338, %v3221_v36  ;;  %3389 = vmax.xlane.f32.xlu0 %v3388_v37 }
 0x956   :  { %v4853_v39 = vpop.f32.mrf.mxu1 }
 0x957   :  { %v3385_v40 = vsel %vm3381_vm11, -1e+09, %v3378_v38  ;;  %v6172_v38 = vld [vmem:[#allocation32_spill] sm:$0xff] }
 0x958   :  { %v3297_v41 = vpop.f32.mrf.mxu0  ;;  %v3373_v42 = vpop.f32.mrf.mxu1  ;;  %v3391_v43 = vsel %vm1059_vm4, %v3385_v40, -inf }
 0x959   :  { %v3379_v44 = vmul.f32 0.35355338, %v3297_v41  ;;  %v3380_v45 = vmul.f32 0.35355338, %v3373_v42  ;;  %3392 = vmax.xlane.f32.xlu1 %v3391_v43  ;;  %v6174_v41 = vld [vmem:[#allocation29_spill] sm:$0xff]  ;;  %v6176_v43 = vld [vmem:[#allocation30_spill] sm:$0xff] }
 0x95a   :  { %v4858_v46 = vpop.f32.mrf.mxu0  ;;  %v4863_v47 = vpop.f32.mrf.mxu1  ;;  %v6175_v42 = vld [vmem:[#allocation33_spill] sm:$0xff] }
 0x95b   :  { %v3387_v49 = vsel %vm3381_vm11, -1e+09, %v3380_v45  ;;  %v3386_v51 = vsel %vm3381_vm11, -1e+09, %v3379_v44  ;;  %v6177_v44 = vld [vmem:[#allocation34_spill] sm:$0xff]  ;;  %v6178_v45 = vld [vmem:[#allocation31_spill] sm:$0xff] }
 0x95c   :  { %v3397_v53 = vsel %vm1059_vm4, %v3387_v49, -inf  ;;  %v3394_v55 = vsel %vm1059_vm4, %v3386_v51, -inf  ;;  %v6179_v46 = vld [vmem:[#allocation35_spill] sm:$0xff]  ;;  %v6180_v47 = vld [vmem:[#allocation36_spill] sm:$0xff] }
 0x95d   :  { %3398 = vmax.xlane.f32.xlu1 %v3397_v53  ;;  %3395 = vmax.xlane.f32.xlu0 %v3394_v55 }
 0x9de   :  { %v3390_v57 = vpop.xlane.xlu0 %3389 }
 0x9df   :  { %v3400_v59 = vsub.f32 %v3384_v35, %v3390_v57 }
 0x9e1   :  { %v3404_v61 = vmul.f32 1.442695, %v3400_v59 }
 0x9e2   :  { %v3393_v63 = vpop.xlane.xlu1 %3392 }
 0x9e3   :  { %4967 = vpow2.f32 %v3404_v61  ;;  %v3401_v2 = vsub.f32 %v3385_v40, %v3393_v63  ;;  %v6173_v40 = vld [vmem:[#allocation28_spill] sm:$0xff] }
 0x9e5   :  { %v3406_v4 = vmul.f32 1.442695, %v3401_v2 }
 0x9e6   :  { %v3399_v6 = vpop.xlane.xlu1 %3398  ;;  %v3396_v58 = vpop.xlane.xlu0 %3395 }
 0x9e7   :  { %4969 = vpow2.f32 %v3406_v4  ;;  %v3403_v0 = vsub.f32 %v3387_v49, %v3399_v6  ;;  %v3402_v20 = vsub.f32 %v3386_v51, %v3396_v58  ;;  %v6181_v49 = vld [vmem:[#allocation37_spill] sm:$0xff] }
 0x9e9   :  { %v3410_v28 = vmul.f32 1.442695, %v3403_v0  ;;  %v3408_v21 = vmul.f32 1.442695, %v3402_v20 }
 0x9eb   :  { %4971 = vpow2.f32 %v3410_v28 }
 0x9ec   :  { %4973 = vpow2.f32 %v3408_v21  ;;  %v6183_v21 = vld [vmem:[#allocation27_spill] sm:$0xff] }
 0x9f0   :  { %v4968_v17 = vpop.eup %4967 }
 0x9f1   :  { %v3412_v3 = vsel %vm1059_vm4, %v4968_v17, 0.0 }
 0x9f2   :  { %3413 = vadd.xlane.f32.xlu0 %v3412_v3 }
 0x9f4   :  { %v4970_v62 = vpop.eup %4969 }
 0x9f5   :  { %v3415_v26 = vsel %vm1059_vm4, %v4970_v62, 0.0 }
 0x9f6   :  { %3416 = vadd.xlane.f32.xlu1 %v3415_v26 }
 0x9f8   :  { %v4972_v54 = vpop.eup %4971 }
 0x9f9   :  { %v4974_v56 = vpop.eup %4973  ;;  %v3421_v29 = vsel %vm1059_vm4, %v4972_v54, 0.0 }
 0x9fa   :  { %3422 = vadd.xlane.f32.xlu1 %v3421_v29  ;;  %v3418_v16 = vsel %vm1059_vm4, %v4974_v56, 0.0 }
 0x9fb   :  { %3419 = vadd.xlane.f32.xlu0 %v3418_v16 }
 0xa7b   :  { %v3414_v52 = vpop.xlane.xlu0 %3413 }
 0xa7c   :  { %4975 = vrcp.f32 %v3414_v52 }
 0xa7f   :  { %v3417_v22 = vpop.xlane.xlu1 %3416 }
 0xa80   :  { %4977 = vrcp.f32 %v3417_v22 }
 0xa83   :  { %v3423_v7 = vpop.xlane.xlu1 %3422 }
 0xa84   :  { %4979 = vrcp.f32 %v3423_v7  ;;  %v3420_v11 = vpop.xlane.xlu0 %3419 }
 0xa85   :  { %4981 = vrcp.f32 %v3420_v11 }
 0xa89   :  { %v4976_v12 = vpop.eup %4975 }
 0xa8a   :  { %v3428_v13 = vmul.f32 %v4976_v12, %v4968_v17 }
 0xa8c   :  { %4867 = vmatmul.mubr.msk.f32.vlgmr.msra.gmra.mxu0 %vm1059_vm4, %v3428_v13 }
 0xa8d   :  { %v4978_v15 = vpop.eup %4977  ;;  %4875 = vmatpush3.msra.mxu0 %v3000_v14  ;;  %4876 = vmatprep.mubr.msk.f32.mxu0 %vm5010_vm1, %v6129_v5 }
 0xa8e   :  { %v3429_v24 = vmul.f32 %v4978_v15, %v4970_v62  ;;  %4884 = vmatprep.subr.mxu0 %v6129_v5 }
 0xa90   :  { %4872 = vmatmul.mubr.msk.f32.vlgmr.msra.gmra.mxu1 %vm1059_vm4, %v3429_v24 }
 0xa91   :  { %v4980_v31 = vpop.eup %4979  ;;  %4880 = vmatpush3.msra.mxu1 %v3070_v30  ;;  %4881 = vmatprep.mubr.msk.f32.mxu1 %vm5010_vm1, %v6129_v5 }
 0xa92   :  { %v4982_v23 = vpop.eup %4981  ;;  %v3431_v27 = vmul.f32 %v4980_v31, %v4972_v54  ;;  %4889 = vmatprep.subr.mxu1 %v6129_v5 }
 0xa93   :  { %v3430_v32 = vmul.f32 %v4982_v23, %v4974_v56 }
 0xa94   :  { %4882 = vmatmul.mubr.msk.f32.vlgmr.msra.gmra.mxu1 %vm1059_vm4, %v3431_v27 }
 0xa95   :  { %4877 = vmatmul.mubr.msk.f32.vlgmr.msra.gmra.mxu0 %vm1059_vm4, %v3430_v32  ;;  %4890 = vmatpush3.msra.mxu1 %v5606_v19 }
 0xa96   :  { %4885 = vmatpush3.msra.mxu0 %v5599_v18  ;;  %4886 = vmatprep.mubr.msk.f32.mxu0 %vm5010_vm1, %v6129_v5 }
 0xa97   :  { %4891 = vmatprep.mubr.msk.f32.mxu1 %vm5010_vm1, %v6129_v5  ;;  %4894 = vmatprep.subr.mxu0 %v6129_v5 }
 0xa98   :  { %4899 = vmatprep.subr.mxu1 %v6129_v5 }
 0xb4c   :  { %v3501_v60 = vpop.f32.mrf.mxu0 }
 0xb4d   :  { %4887 = vmatmul.mubr.msk.f32.vlgmr.msra.gmra.mxu0 %vm1059_vm4, %v3501_v60 }
 0xb4e   :  { %v4868_v48 = vpop.f32.mrf.mxu0  ;;  %4895 = vmatpush3.msra.mxu0 %v6170_v33  ;;  %4896 = vmatprep.mubr.msk.f32.mxu0 %vm5010_vm1, %v6129_v5 }
 0xb4f   :  { %4904 = vmatprep.subr.mxu0 %v6129_v5 }
 0xb50   :  { %v3574_v18 = vpop.f32.mrf.mxu1 }
 0xb51   :  { %4892 = vmatmul.mubr.msk.f32.vlgmr.msra.gmra.mxu1 %vm1059_vm4, %v3574_v18 }
 0xb52   :  { %v4873_v19 = vpop.f32.mrf.mxu1  ;;  %4900 = vmatpush3.msra.mxu1 %v6171_v34  ;;  %4901 = vmatprep.mubr.msk.f32.mxu1 %vm5010_vm1, %v6129_v5 }
 0xb53   :  { %4915 = vmatprep.subr.mxu1 %v6129_v5 }
 0xb54   :  { %v3720_v35 = vpop.f32.mrf.mxu1 }
 0xb55   :  { %v3647_v36 = vpop.f32.mrf.mxu0  ;;  %4902 = vmatmul.mubr.msk.f32.vlgmr.msra.gmra.mxu1 %vm1059_vm4, %v3720_v35 }
 0xb56   :  { %4897 = vmatmul.mubr.msk.f32.vlgmr.msra.gmra.mxu0 %vm1059_vm4, %v3647_v36  ;;  %v4883_v37 = vpop.f32.mrf.mxu1  ;;  %4916 = vmatpush3.msra.mxu1 %v6172_v38 }
 0xb57   :  { %v4878_v39 = vpop.f32.mrf.mxu0  ;;  %4905 = vmatpush3.msra.mxu0 %v6173_v40  ;;  %4912 = vmatprep.mubr.msk.f32.mxu0 %vm5010_vm1, %v6129_v5 }
 0xb58   :  { %4906 = vmatprep.subr.mxu0 %v6129_v5  ;;  %4917 = vmatprep.subr.mxu1 %v6129_v5 }
 0xb59   :  { %4907 = vmatpush3.msra.mxu0 %v6174_v41  ;;  %4918 = vmatpush3.msra.mxu1 %v6175_v42 }
 0xb5a   :  { %4908 = vmatprep.subr.mxu0 %v6129_v5  ;;  %4919 = vmatprep.subr.mxu1 %v6129_v5 }
 0xb5b   :  { %4909 = vmatpush3.msra.mxu0 %v6176_v43  ;;  %4920 = vmatpush3.msra.mxu1 %v6177_v44 }
 0xb5c   :  { %4910 = vmatprep.subr.mxu0 %v6129_v5  ;;  %4921 = vmatprep.subr.mxu1 %v6129_v5 }
 0xb5d   :  { %4911 = vmatpush3.msra.mxu0 %v6178_v45  ;;  %4922 = vmatpush3.msra.mxu1 %v6179_v46 }
 0xb5e   :  { %4923 = vmatprep.subr.mxu1 %v6129_v5  ;;  %4931 = vmatprep.mubr.msk.f32.mxu1 %vm5010_vm1, %v6129_v5 }
 0xb5f   :  { %4924 = vmatpush3.msra.mxu1 %v6180_v47 }
 0xb60   :  { %4925 = vmatprep.subr.mxu1 %v6129_v5 }
 0xb61   :  { %4926 = vmatpush3.msra.mxu1 %v6181_v49 }
 0xb62   :  { %4927 = vmatprep.subr.mxu1 %v6129_v5 }
 0xb63   :  { %4928 = vmatpush3.msra.mxu1 %v5848_v8 }
 0xb64   :  { %4929 = vmatprep.subr.mxu1 %v6129_v5 }
 0xb65   :  { %4930 = vmatpush3.msra.mxu1 %v5853_v9  ;;  %v6182_v9 = vld [vmem:[#allocation26_spill] sm:$0xff] }
 0xc0d   :  { %v3793_v51 = vpop.f32.mrf.mxu0 }
 0xc0e   :  { %v4016_v61 = vsel %vm112_vm0, %v3793_v51, 0.0 }
 0xc0f   :  { %v4888_v53 = vpop.f32.mrf.mxu0 }
 0xc11   :  { %v3866_v55 = vpop.f32.mrf.mxu1 }
 0xc12   :  { %v4017_v57 = vsel %vm112_vm0, %v3866_v55, 0.0 }
 0xc13   :  { %v4893_v59 = vpop.f32.mrf.mxu1  ;;  %v4018_v2 = vadd.f32 %v4017_v57, %v4016_v61 }
 0xc15   :  { %v4012_v63 = vpop.f32.mrf.mxu1 }
 0xc16   :  { %v3939_v4 = vpop.f32.mrf.mxu0  ;;  %v4021_v5 = vsel %vm112_vm0, %v4012_v63, 0.0 }
 0xc17   :  { %v4019_v6 = vsel %vm112_vm0, %v3939_v4, 0.0  ;;  %v4903_v58 = vpop.f32.mrf.mxu1 }
 0xc18   :  { %v4020_v0 = vadd.f32 %v4019_v6, %v4018_v2  ;;  %v4898_v8 = vpop.f32.mrf.mxu0 }
 0xc1a   :  { %v4022_v20 = vadd.f32 %v4021_v5, %v4020_v0 }
 0xc1c   :  { %v4023_v28 = vadd.f32 %v6182_v9, %v4022_v20 }
 0xc1e   :  { %v4024_v17 = vadd.f32 %v6183_v21, %v4023_v28 }
 0xc20   :  { %v4025_v3 = vsel %vm112_vm0, %v4024_v17, 0.0 }
 0xc21   :  { %4026 = vadd.xlane.f32.xlu0 %v4025_v3 }
 0xcaa   :  { %v4027_v62 = vpop.xlane.xlu0 %4026 }
 0xcab   :  { %v4028_v26 = vmul.f32 0.03125, %v4027_v62 }
 0xcad   :  { %v4029_v54 = vsub.f32 %v4024_v17, %v4028_v26 }
 0xcaf   :  { %v4030_v56 = vmul.f32 %v4029_v54, %v4029_v54  ;;  %v4044_v15 = vmul.f32 %v5743_v1, %v4029_v54 }
 0xcb1   :  { %v4031_v29 = vsel %vm112_vm0, %v4030_v56, 0.0 }
 0xcb2   :  { %4032 = vadd.xlane.f32.xlu1 %v4031_v29 }
 0xd3b   :  { %v4033_v16 = vpop.xlane.xlu1 %4032 }
 0xd3c   :  { %v4034_v52 = vmul.f32 0.032258064, %v4033_v16 }
 0xd3e   :  { %4983 = vrsqrt.f32 %v4034_v52  ;;  %vm4037_vm12 = vcmp.eq.f32.partialorder %v4034_v52, inf  ;;  %v4040_v11 = vand.u32 2147483648, %v4034_v52  ;;  %vm4039_vm13 = vcmp.eq.f32.partialorder %v4034_v52, 0.0 }
 0xd4b   :  { %v4984_v22 = vpop.eup %4983 }
 0xd4c   :  { %v4036_v7 = vmul.f32 %v4984_v22, %v4034_v52 }
 0xd4e   :  { %v4038_v12 = vsel %vm4037_vm12, %v4034_v52, %v4036_v7 }
 0xd4f   :  { %v4041_v13 = vsel %vm4039_vm13, %v4040_v11, %v4038_v12 }
 0xd50   :  { %v4042_v14 = vadd.f32 1e-06, %v4041_v13 }
 0xd52   :  { %4985 = vrcp.f32 %v4042_v14 }
 0xd5f   :  { %v4986_v24 = vpop.eup %4985 }
 0xd60   :  { %v4045_v30 = vmul.f32 %v4986_v24, %v4044_v15 }
 0xd62   :  { %v4046_v31 = vadd.f32 %v5750_v25, %v4045_v30 }
 0xd64   :  { %4913 = vmatmul.mubr.msk.f32.vlgmr.msra.gmra.mxu0 %vm112_vm0, %v4046_v31 }
 0xe24   :  { %v4116_v23 = vpop.f32.mrf.mxu0 }
 0xe25   :  { %v4117_v27 = vadd.f32 %v5862_v10, %v4116_v23 }
 0xe26   :  { %v4914_v32 = vpop.f32.mrf.mxu0 }
 0xe27   :  { %v4120_v60 = vmax.f32 %v4117_v27, 0.0 }
 0xe29   :  { %4932 = vmatmul.mubr.msk.f32.vlgmr.msra.gmra.mxu1 %vm2128_vm10, %v4120_v60 }
 0xee9   :  { %v4190_v48 = vpop.f32.mrf.mxu1 }
 0xeea   :  { %v4191_v33 = vadd.f32 %v5939_v50, %v4190_v48 }
 0xeeb   :  { %v4933_v18 = vpop.f32.mrf.mxu1 }
 0xeec   :  { %v4194_v1 = vadd.f32 %v4191_v33, %v4024_v17 }
 0xeee   :  { %4196 = vst.msk [vmem:[#allocation2 + $0x8] sm:$0xff] %vm112_vm0, %v4194_v1 }
 0xeef   :  { %4998 = shalt.err (!%p4995_p4)
}
 0xef0   :  { %s5012_s28 = smov 128   ;;  %s5013_s29 = smov 8  }
 0xef1   :  { %4208 = dma.vmem_to_hbm [thread:$0]  %s4203_s26, 256, %s6081_s7, [#allocation3], %s5012_s28, %s5012_s28, %s5013_s29  }
 0xef2   :  { %5007 = dma.done.wait [#allocation3], 256  }
 0xef3   :  { %5008 = vsyncadd [#allocation3], 4294967040 }
 0xef4   :  { %4212 = vsyncpa [#allocation3], 1 }

</bundles_post_ra>
